<compile_context>
chip_gen: v6e
topology: v6e:2x2x1
jax: 0.10.0
libtpu: 0.0.40
codegen_flags: <defaults>
</compile_context>

<pallas_src>
import functools

import jax
import jax.numpy as jnp
import numpy as np
from jax.experimental import pallas as pl
from jax.experimental.pallas import tpu as pltpu

_BN_EPS = 1e-5
_VMEM = pl.BlockSpec(memory_space=pltpu.MemorySpace.VMEM)


# ----------------------------- fused Pallas kernel -----------------------------

def _matmul(x, w, compute_dtype):
    # MXU matmul with f32 accumulation; operands optionally cast to bf16
    # (roughly 2x MXU throughput + half the VMEM bytes on v6e/v7x).
    return jnp.dot(
        x.astype(compute_dtype),
        w.astype(compute_dtype),
        preferred_element_type=jnp.float32,
    )


def _linear_bn_relu(x, w, b, gamma, beta, compute_dtype):
    # relu(BatchNorm1d(x @ w + b)) -- training-mode BN (batch statistics,
    # biased variance, eps=1e-5), matching nn.BatchNorm1d's default forward.
    h = _matmul(x, w, compute_dtype) + b
    mean = jnp.mean(h, axis=0, keepdims=True)
    var = jnp.mean((h - mean) ** 2, axis=0, keepdims=True)
    scale = gamma * jax.lax.rsqrt(var + _BN_EPS)      # folded BN scale (EUP rsqrt)
    shift = beta - mean * scale                       # folded BN shift
    return jnp.maximum(h * scale + shift, 0.0)


def _ae_fused_kernel(
    # input
    x_ref,
    # encoder
    e1w, e1b, bn1g, bn1b,
    e2w, e2b, bn2g, bn2b,
    e3w, e3b, bn3g, bn3b,
    zw, zb,
    # decoder
    d1w, d1b, bn4g, bn4b,
    d2w, d2b, bn5g, bn5b,
    d3w, d3b, bn6g, bn6b,
    xbw, xbb,
    # outputs (same order as the torch module's return tuple)
    xbar_ref, h1_ref, h2_ref, h3_ref, z_ref, dh3_ref,
    *, compute_dtype,
):
    x = x_ref[...]

    h1 = _linear_bn_relu(x,  e1w[...], e1b[...], bn1g[...], bn1b[...], compute_dtype)
    h2 = _linear_bn_relu(h1, e2w[...], e2b[...], bn2g[...], bn2b[...], compute_dtype)
    h3 = _linear_bn_relu(h2, e3w[...], e3b[...], bn3g[...], bn3b[...], compute_dtype)
    z = _matmul(h3, zw[...], compute_dtype) + zb[...]

    d1 = _linear_bn_relu(z,  d1w[...], d1b[...], bn4g[...], bn4b[...], compute_dtype)
    d2 = _linear_bn_relu(d1, d2w[...], d2b[...], bn5g[...], bn5b[...], compute_dtype)
    d3 = _linear_bn_relu(d2, d3w[...], d3b[...], bn6g[...], bn6b[...], compute_dtype)
    x_bar = _matmul(d3, xbw[...], compute_dtype) + xbb[...]

    xbar_ref[...] = x_bar
    h1_ref[...] = h1
    h2_ref[...] = h2
    h3_ref[...] = h3
    z_ref[...] = z           # narrow (N, n_z) store; z itself never leaves VMEM
    dh3_ref[...] = d3


# --------------------------------- wrapper ---------------------------------

_PARAM_ORDER = (
    "enc1_w", "enc1_b", "bn1_g", "bn1_b",
    "enc2_w", "enc2_b", "bn2_g", "bn2_b",
    "enc3_w", "enc3_b", "bn3_g", "bn3_b",
    "zl_w", "zl_b",
    "dec1_w", "dec1_b", "bn4_g", "bn4_b",
    "dec2_w", "dec2_b", "bn5_g", "bn5_b",
    "dec3_w", "dec3_b", "bn6_g", "bn6_b",
    "xbar_w", "xbar_b",
)


def ae_forward(params, x, *, compute_dtype=jnp.float32):
    """Fused AE forward. Returns (x_bar, enc_h1, enc_h2, enc_h3, z, dec_h3)."""
    n = x.shape[0]
    args = (x,) + tuple(params[k] for k in _PARAM_ORDER)

    out_shape = (
        jax.ShapeDtypeStruct((n, params["xbar_w"].shape[1]), jnp.float32),  # x_bar
        jax.ShapeDtypeStruct((n, params["enc1_w"].shape[1]), jnp.float32),  # enc_h1
        jax.ShapeDtypeStruct((n, params["enc2_w"].shape[1]), jnp.float32),  # enc_h2
        jax.ShapeDtypeStruct((n, params["enc3_w"].shape[1]), jnp.float32),  # enc_h3
        jax.ShapeDtypeStruct((n, params["zl_w"].shape[1]), jnp.float32),    # z
        jax.ShapeDtypeStruct((n, params["dec3_w"].shape[1]), jnp.float32),  # dec_h3
    )

    kernel = functools.partial(_ae_fused_kernel, compute_dtype=compute_dtype)
    return pl.pallas_call(
        kernel,
        out_shape=out_shape,
        in_specs=[_VMEM] * len(args),
        out_specs=tuple([_VMEM] * len(out_shape)),
        compiler_params=pltpu.CompilerParams(
            # Raise the scoped-VMEM cap (defaults are well below physical on
            # v5e/v6e); 64 MiB also respects v7x's per-TC physical VMEM.
            vmem_limit_bytes=64 * 1024 * 1024,
        ),
    )(*args)


# ------------------------------ pure-JAX reference ------------------------------

def ae_forward_ref(p, x):
    def lbr(x, w, b, g, beta):
        h = jnp.dot(x, w) + b
        mean = jnp.mean(h, axis=0, keepdims=True)
        var = jnp.mean((h - mean) ** 2, axis=0, keepdims=True)
        h = (h - mean) * jax.lax.rsqrt(var + _BN_EPS) * g + beta
        return jnp.maximum(h, 0.0)

    h1 = lbr(x, p["enc1_w"], p["enc1_b"], p["bn1_g"], p["bn1_b"])
    h2 = lbr(h1, p["enc2_w"], p["enc2_b"], p["bn2_g"], p["bn2_b"])
    h3 = lbr(h2, p["enc3_w"], p["enc3_b"], p["bn3_g"], p["bn3_b"])
    z = jnp.dot(h3, p["zl_w"]) + p["zl_b"]
    d1 = lbr(z, p["dec1_w"], p["dec1_b"], p["bn4_g"], p["bn4_b"])
    d2 = lbr(d1, p["dec2_w"], p["dec2_b"], p["bn5_g"], p["bn5_b"])
    d3 = lbr(d2, p["dec3_w"], p["dec3_b"], p["bn6_g"], p["bn6_b"])
    x_bar = jnp.dot(d3, p["xbar_w"]) + p["xbar_b"]
    return x_bar, h1, h2, h3, z, d3


# ------------------------------ param init ---------------------------------

def init_params(key, d):
    keys = iter(jax.random.split(key, 32))

    def W(shape):
        return (1.0 / jnp.sqrt(shape[0])) * jax.random.normal(
            next(keys), shape, dtype=jnp.float32
        )

    def B(width):
        return 0.01 * jax.random.normal(next(keys), (1, width), dtype=jnp.float32)

    def BN(width):
        return jnp.ones((1, width), jnp.float32), jnp.zeros((1, width), jnp.float32)

    ni, e1, e2, e3 = d["n_input"], d["n_enc_1"], d["n_enc_2"], d["n_enc_3"]
    dd1, dd2, dd3, nz = d["n_dec_1"], d["n_dec_2"], d["n_dec_3"], d["n_z"]

    p = {}
    p["enc1_w"], p["enc1_b"] = W((ni, e1)), B(e1)
    p["bn1_g"], p["bn1_b"] = BN(e1)
    p["enc2_w"], p["enc2_b"] = W((e1, e2)), B(e2)
    p["bn2_g"], p["bn2_b"] = BN(e2)
    p["enc3_w"], p["enc3_b"] = W((e2, e3)), B(e3)
    p["bn3_g"], p["bn3_b"] = BN(e3)
    p["zl_w"], p["zl_b"] = W((e3, nz)), B(nz)
    p["dec1_w"], p["dec1_b"] = W((nz, dd1)), B(dd1)
    p["bn4_g"], p["bn4_b"] = BN(dd1)
    p["dec2_w"], p["dec2_b"] = W((dd1, dd2)), B(dd2)
    p["bn5_g"], p["bn5_b"] = BN(dd2)
    p["dec3_w"], p["dec3_b"] = W((dd2, dd3)), B(dd3)
    p["bn6_g"], p["bn6_b"] = BN(dd3)
    p["xbar_w"], p["xbar_b"] = W((dd3, ni)), B(ni)
    return p


# --------------------------------- main -------------------------------------

if __name__ == "__main__":
    key = jax.random.PRNGKey(0)
    N = 64
    dims = dict(
        n_input=64, n_enc_1=32, n_enc_2=32, n_enc_3=64,
        n_dec_1=64, n_dec_2=32, n_dec_3=32, n_z=16,
    )

    kx, kparam = jax.random.split(key, 2)
    x = jax.random.normal(kx, (N, dims["n_input"]), dtype=jnp.float32)
    params = init_params(kparam, dims)

    fwd = jax.jit(ae_forward)
    outs = jax.block_until_ready(fwd(params, x))
    x_bar, enc_h1, enc_h2, enc_h3, z, dec_h3 = outs

    # shape checks (match torch AE.forward return tuple)
    assert x_bar.shape == (N, dims["n_input"])
    assert enc_h1.shape == (N, dims["n_enc_1"])
    assert enc_h2.shape == (N, dims["n_enc_2"])
    assert enc_h3.shape == (N, dims["n_enc_3"])
    assert z.shape == (N, dims["n_z"])
    assert dec_h3.shape == (N, dims["n_dec_3"])

    # numerical parity vs a pure-JAX reference of the torch forward
    refs = ae_forward_ref(params, x)
    for got, want in zip(outs, refs):
        assert bool(jnp.all(jnp.isfinite(got)))
        assert np.allclose(np.asarray(got), np.asarray(want), rtol=2e-3, atol=2e-3)

    print("KERNEL_OK")
</pallas_src>

<mosaic_0001>
module attributes {stable_mosaic.version = 11 : i64} {
  func.func @_ae_fused_kernel(%arg0: memref<64x64xf32, #tpu.memory_space<vmem>>, %arg1: memref<64x32xf32, #tpu.memory_space<vmem>>, %arg2: memref<1x32xf32, #tpu.memory_space<vmem>>, %arg3: memref<1x32xf32, #tpu.memory_space<vmem>>, %arg4: memref<1x32xf32, #tpu.memory_space<vmem>>, %arg5: memref<32x32xf32, #tpu.memory_space<vmem>>, %arg6: memref<1x32xf32, #tpu.memory_space<vmem>>, %arg7: memref<1x32xf32, #tpu.memory_space<vmem>>, %arg8: memref<1x32xf32, #tpu.memory_space<vmem>>, %arg9: memref<32x64xf32, #tpu.memory_space<vmem>>, %arg10: memref<1x64xf32, #tpu.memory_space<vmem>>, %arg11: memref<1x64xf32, #tpu.memory_space<vmem>>, %arg12: memref<1x64xf32, #tpu.memory_space<vmem>>, %arg13: memref<64x16xf32, #tpu.memory_space<vmem>>, %arg14: memref<1x16xf32, #tpu.memory_space<vmem>>, %arg15: memref<16x64xf32, #tpu.memory_space<vmem>>, %arg16: memref<1x64xf32, #tpu.memory_space<vmem>>, %arg17: memref<1x64xf32, #tpu.memory_space<vmem>>, %arg18: memref<1x64xf32, #tpu.memory_space<vmem>>, %arg19: memref<64x32xf32, #tpu.memory_space<vmem>>, %arg20: memref<1x32xf32, #tpu.memory_space<vmem>>, %arg21: memref<1x32xf32, #tpu.memory_space<vmem>>, %arg22: memref<1x32xf32, #tpu.memory_space<vmem>>, %arg23: memref<32x32xf32, #tpu.memory_space<vmem>>, %arg24: memref<1x32xf32, #tpu.memory_space<vmem>>, %arg25: memref<1x32xf32, #tpu.memory_space<vmem>>, %arg26: memref<1x32xf32, #tpu.memory_space<vmem>>, %arg27: memref<32x64xf32, #tpu.memory_space<vmem>>, %arg28: memref<1x64xf32, #tpu.memory_space<vmem>>, %arg29: memref<64x64xf32, #tpu.memory_space<vmem>>, %arg30: memref<64x32xf32, #tpu.memory_space<vmem>>, %arg31: memref<64x32xf32, #tpu.memory_space<vmem>>, %arg32: memref<64x64xf32, #tpu.memory_space<vmem>>, %arg33: memref<64x16xf32, #tpu.memory_space<vmem>>, %arg34: memref<64x32xf32, #tpu.memory_space<vmem>>) attributes {dimension_semantics = [], scalar_prefetch = 0 : i64, scratch_operands = 0 : i64, tpu.core_type = #tpu.core_type<tc>} {
    %c0 = arith.constant 0 : index
    %c0_0 = arith.constant 0 : index
    %0 = vector.load %arg0[%c0, %c0_0] : memref<64x64xf32, #tpu.memory_space<vmem>>, vector<64x64xf32>
    %c0_1 = arith.constant 0 : index
    %c0_2 = arith.constant 0 : index
    %1 = vector.load %arg1[%c0_1, %c0_2] : memref<64x32xf32, #tpu.memory_space<vmem>>, vector<64x32xf32>
    %c0_3 = arith.constant 0 : index
    %c0_4 = arith.constant 0 : index
    %2 = vector.load %arg2[%c0_3, %c0_4] : memref<1x32xf32, #tpu.memory_space<vmem>>, vector<1x32xf32>
    %c0_5 = arith.constant 0 : index
    %c0_6 = arith.constant 0 : index
    %3 = vector.load %arg3[%c0_5, %c0_6] : memref<1x32xf32, #tpu.memory_space<vmem>>, vector<1x32xf32>
    %c0_7 = arith.constant 0 : index
    %c0_8 = arith.constant 0 : index
    %4 = vector.load %arg4[%c0_7, %c0_8] : memref<1x32xf32, #tpu.memory_space<vmem>>, vector<1x32xf32>
    %cst = arith.constant dense<0.000000e+00> : vector<64x32xf32>
    %5 = tpu.matmul %0, %1, %cst {dimension_numbers = #tpu.dot_dimension_numbers<[1], [0], [0], [1], [0, 0, 1, 1], [], []>} : vector<64x64xf32>, vector<64x32xf32>, vector<64x32xf32> -> vector<64x32xf32>
    %6 = vector.broadcast %2 : vector<1x32xf32> to vector<64x32xf32>
    %7 = arith.addf %5, %6 : vector<64x32xf32>
    %cst_9 = arith.constant dense<0.000000e+00> : vector<32xf32>
    %8 = vector.multi_reduction <add>, %7, %cst_9 [0] : vector<64x32xf32> to vector<32xf32>
    %9 = vector.shape_cast %8 : vector<32xf32> to vector<1x32xf32>
    %cst_10 = arith.constant 6.400000e+01 : f32
    %10 = vector.broadcast %cst_10 : f32 to vector<1x32xf32>
    %11 = arith.divf %9, %10 : vector<1x32xf32>
    %12 = vector.broadcast %11 : vector<1x32xf32> to vector<64x32xf32>
    %13 = arith.subf %7, %12 : vector<64x32xf32>
    %14 = arith.mulf %13, %13 : vector<64x32xf32>
    %cst_11 = arith.constant dense<0.000000e+00> : vector<32xf32>
    %15 = vector.multi_reduction <add>, %14, %cst_11 [0] : vector<64x32xf32> to vector<32xf32>
    %16 = vector.shape_cast %15 : vector<32xf32> to vector<1x32xf32>
    %cst_12 = arith.constant 6.400000e+01 : f32
    %17 = vector.broadcast %cst_12 : f32 to vector<1x32xf32>
    %18 = arith.divf %16, %17 : vector<1x32xf32>
    %cst_13 = arith.constant 9.99999974E-6 : f32
    %19 = vector.broadcast %cst_13 : f32 to vector<1x32xf32>
    %20 = arith.addf %18, %19 : vector<1x32xf32>
    %21 = math.rsqrt %20 : vector<1x32xf32>
    %22 = arith.mulf %3, %21 : vector<1x32xf32>
    %23 = arith.mulf %11, %22 : vector<1x32xf32>
    %24 = arith.subf %4, %23 : vector<1x32xf32>
    %25 = vector.broadcast %22 : vector<1x32xf32> to vector<64x32xf32>
    %26 = arith.mulf %7, %25 : vector<64x32xf32>
    %27 = vector.broadcast %24 : vector<1x32xf32> to vector<64x32xf32>
    %28 = arith.addf %26, %27 : vector<64x32xf32>
    %cst_14 = arith.constant 0.000000e+00 : f32
    %29 = vector.broadcast %cst_14 : f32 to vector<64x32xf32>
    %30 = arith.maximumf %28, %29 : vector<64x32xf32>
    %c0_15 = arith.constant 0 : index
    %c0_16 = arith.constant 0 : index
    %31 = vector.load %arg5[%c0_15, %c0_16] : memref<32x32xf32, #tpu.memory_space<vmem>>, vector<32x32xf32>
    %c0_17 = arith.constant 0 : index
    %c0_18 = arith.constant 0 : index
    %32 = vector.load %arg6[%c0_17, %c0_18] : memref<1x32xf32, #tpu.memory_space<vmem>>, vector<1x32xf32>
    %c0_19 = arith.constant 0 : index
    %c0_20 = arith.constant 0 : index
    %33 = vector.load %arg7[%c0_19, %c0_20] : memref<1x32xf32, #tpu.memory_space<vmem>>, vector<1x32xf32>
    %c0_21 = arith.constant 0 : index
    %c0_22 = arith.constant 0 : index
    %34 = vector.load %arg8[%c0_21, %c0_22] : memref<1x32xf32, #tpu.memory_space<vmem>>, vector<1x32xf32>
    %cst_23 = arith.constant dense<0.000000e+00> : vector<64x32xf32>
    %35 = tpu.matmul %30, %31, %cst_23 {dimension_numbers = #tpu.dot_dimension_numbers<[1], [0], [0], [1], [0, 0, 1, 1], [], []>} : vector<64x32xf32>, vector<32x32xf32>, vector<64x32xf32> -> vector<64x32xf32>
    %36 = vector.broadcast %32 : vector<1x32xf32> to vector<64x32xf32>
    %37 = arith.addf %35, %36 : vector<64x32xf32>
    %cst_24 = arith.constant dense<0.000000e+00> : vector<32xf32>
    %38 = vector.multi_reduction <add>, %37, %cst_24 [0] : vector<64x32xf32> to vector<32xf32>
    %39 = vector.shape_cast %38 : vector<32xf32> to vector<1x32xf32>
    %cst_25 = arith.constant 6.400000e+01 : f32
    %40 = vector.broadcast %cst_25 : f32 to vector<1x32xf32>
    %41 = arith.divf %39, %40 : vector<1x32xf32>
    %42 = vector.broadcast %41 : vector<1x32xf32> to vector<64x32xf32>
    %43 = arith.subf %37, %42 : vector<64x32xf32>
    %44 = arith.mulf %43, %43 : vector<64x32xf32>
    %cst_26 = arith.constant dense<0.000000e+00> : vector<32xf32>
    %45 = vector.multi_reduction <add>, %44, %cst_26 [0] : vector<64x32xf32> to vector<32xf32>
    %46 = vector.shape_cast %45 : vector<32xf32> to vector<1x32xf32>
    %cst_27 = arith.constant 6.400000e+01 : f32
    %47 = vector.broadcast %cst_27 : f32 to vector<1x32xf32>
    %48 = arith.divf %46, %47 : vector<1x32xf32>
    %cst_28 = arith.constant 9.99999974E-6 : f32
    %49 = vector.broadcast %cst_28 : f32 to vector<1x32xf32>
    %50 = arith.addf %48, %49 : vector<1x32xf32>
    %51 = math.rsqrt %50 : vector<1x32xf32>
    %52 = arith.mulf %33, %51 : vector<1x32xf32>
    %53 = arith.mulf %41, %52 : vector<1x32xf32>
    %54 = arith.subf %34, %53 : vector<1x32xf32>
    %55 = vector.broadcast %52 : vector<1x32xf32> to vector<64x32xf32>
    %56 = arith.mulf %37, %55 : vector<64x32xf32>
    %57 = vector.broadcast %54 : vector<1x32xf32> to vector<64x32xf32>
    %58 = arith.addf %56, %57 : vector<64x32xf32>
    %cst_29 = arith.constant 0.000000e+00 : f32
    %59 = vector.broadcast %cst_29 : f32 to vector<64x32xf32>
    %60 = arith.maximumf %58, %59 : vector<64x32xf32>
    %c0_30 = arith.constant 0 : index
    %c0_31 = arith.constant 0 : index
    %61 = vector.load %arg9[%c0_30, %c0_31] : memref<32x64xf32, #tpu.memory_space<vmem>>, vector<32x64xf32>
    %c0_32 = arith.constant 0 : index
    %c0_33 = arith.constant 0 : index
    %62 = vector.load %arg10[%c0_32, %c0_33] : memref<1x64xf32, #tpu.memory_space<vmem>>, vector<1x64xf32>
    %c0_34 = arith.constant 0 : index
    %c0_35 = arith.constant 0 : index
    %63 = vector.load %arg11[%c0_34, %c0_35] : memref<1x64xf32, #tpu.memory_space<vmem>>, vector<1x64xf32>
    %c0_36 = arith.constant 0 : index
    %c0_37 = arith.constant 0 : index
    %64 = vector.load %arg12[%c0_36, %c0_37] : memref<1x64xf32, #tpu.memory_space<vmem>>, vector<1x64xf32>
    %cst_38 = arith.constant dense<0.000000e+00> : vector<64x64xf32>
    %65 = tpu.matmul %60, %61, %cst_38 {dimension_numbers = #tpu.dot_dimension_numbers<[1], [0], [0], [1], [0, 0, 1, 1], [], []>} : vector<64x32xf32>, vector<32x64xf32>, vector<64x64xf32> -> vector<64x64xf32>
    %66 = vector.broadcast %62 : vector<1x64xf32> to vector<64x64xf32>
    %67 = arith.addf %65, %66 : vector<64x64xf32>
    %cst_39 = arith.constant dense<0.000000e+00> : vector<64xf32>
    %68 = vector.multi_reduction <add>, %67, %cst_39 [0] : vector<64x64xf32> to vector<64xf32>
    %69 = vector.shape_cast %68 : vector<64xf32> to vector<1x64xf32>
    %cst_40 = arith.constant 6.400000e+01 : f32
    %70 = vector.broadcast %cst_40 : f32 to vector<1x64xf32>
    %71 = arith.divf %69, %70 : vector<1x64xf32>
    %72 = vector.broadcast %71 : vector<1x64xf32> to vector<64x64xf32>
    %73 = arith.subf %67, %72 : vector<64x64xf32>
    %74 = arith.mulf %73, %73 : vector<64x64xf32>
    %cst_41 = arith.constant dense<0.000000e+00> : vector<64xf32>
    %75 = vector.multi_reduction <add>, %74, %cst_41 [0] : vector<64x64xf32> to vector<64xf32>
    %76 = vector.shape_cast %75 : vector<64xf32> to vector<1x64xf32>
    %cst_42 = arith.constant 6.400000e+01 : f32
    %77 = vector.broadcast %cst_42 : f32 to vector<1x64xf32>
    %78 = arith.divf %76, %77 : vector<1x64xf32>
    %cst_43 = arith.constant 9.99999974E-6 : f32
    %79 = vector.broadcast %cst_43 : f32 to vector<1x64xf32>
    %80 = arith.addf %78, %79 : vector<1x64xf32>
    %81 = math.rsqrt %80 : vector<1x64xf32>
    %82 = arith.mulf %63, %81 : vector<1x64xf32>
    %83 = arith.mulf %71, %82 : vector<1x64xf32>
    %84 = arith.subf %64, %83 : vector<1x64xf32>
    %85 = vector.broadcast %82 : vector<1x64xf32> to vector<64x64xf32>
    %86 = arith.mulf %67, %85 : vector<64x64xf32>
    %87 = vector.broadcast %84 : vector<1x64xf32> to vector<64x64xf32>
    %88 = arith.addf %86, %87 : vector<64x64xf32>
    %cst_44 = arith.constant 0.000000e+00 : f32
    %89 = vector.broadcast %cst_44 : f32 to vector<64x64xf32>
    %90 = arith.maximumf %88, %89 : vector<64x64xf32>
    %c0_45 = arith.constant 0 : index
    %c0_46 = arith.constant 0 : index
    %91 = vector.load %arg13[%c0_45, %c0_46] : memref<64x16xf32, #tpu.memory_space<vmem>>, vector<64x16xf32>
    %cst_47 = arith.constant dense<0.000000e+00> : vector<64x16xf32>
    %92 = tpu.matmul %90, %91, %cst_47 {dimension_numbers = #tpu.dot_dimension_numbers<[1], [0], [0], [1], [0, 0, 1, 1], [], []>} : vector<64x64xf32>, vector<64x16xf32>, vector<64x16xf32> -> vector<64x16xf32>
    %c0_48 = arith.constant 0 : index
    %c0_49 = arith.constant 0 : index
    %93 = vector.load %arg14[%c0_48, %c0_49] : memref<1x16xf32, #tpu.memory_space<vmem>>, vector<1x16xf32>
    %94 = vector.broadcast %93 : vector<1x16xf32> to vector<64x16xf32>
    %95 = arith.addf %92, %94 : vector<64x16xf32>
    %c0_50 = arith.constant 0 : index
    %c0_51 = arith.constant 0 : index
    %96 = vector.load %arg15[%c0_50, %c0_51] : memref<16x64xf32, #tpu.memory_space<vmem>>, vector<16x64xf32>
    %c0_52 = arith.constant 0 : index
    %c0_53 = arith.constant 0 : index
    %97 = vector.load %arg16[%c0_52, %c0_53] : memref<1x64xf32, #tpu.memory_space<vmem>>, vector<1x64xf32>
    %c0_54 = arith.constant 0 : index
    %c0_55 = arith.constant 0 : index
    %98 = vector.load %arg17[%c0_54, %c0_55] : memref<1x64xf32, #tpu.memory_space<vmem>>, vector<1x64xf32>
    %c0_56 = arith.constant 0 : index
    %c0_57 = arith.constant 0 : index
    %99 = vector.load %arg18[%c0_56, %c0_57] : memref<1x64xf32, #tpu.memory_space<vmem>>, vector<1x64xf32>
    %cst_58 = arith.constant dense<0.000000e+00> : vector<64x64xf32>
    %100 = tpu.matmul %95, %96, %cst_58 {dimension_numbers = #tpu.dot_dimension_numbers<[1], [0], [0], [1], [0, 0, 1, 1], [], []>} : vector<64x16xf32>, vector<16x64xf32>, vector<64x64xf32> -> vector<64x64xf32>
    %101 = vector.broadcast %97 : vector<1x64xf32> to vector<64x64xf32>
    %102 = arith.addf %100, %101 : vector<64x64xf32>
    %cst_59 = arith.constant dense<0.000000e+00> : vector<64xf32>
    %103 = vector.multi_reduction <add>, %102, %cst_59 [0] : vector<64x64xf32> to vector<64xf32>
    %104 = vector.shape_cast %103 : vector<64xf32> to vector<1x64xf32>
    %cst_60 = arith.constant 6.400000e+01 : f32
    %105 = vector.broadcast %cst_60 : f32 to vector<1x64xf32>
    %106 = arith.divf %104, %105 : vector<1x64xf32>
    %107 = vector.broadcast %106 : vector<1x64xf32> to vector<64x64xf32>
    %108 = arith.subf %102, %107 : vector<64x64xf32>
    %109 = arith.mulf %108, %108 : vector<64x64xf32>
    %cst_61 = arith.constant dense<0.000000e+00> : vector<64xf32>
    %110 = vector.multi_reduction <add>, %109, %cst_61 [0] : vector<64x64xf32> to vector<64xf32>
    %111 = vector.shape_cast %110 : vector<64xf32> to vector<1x64xf32>
    %cst_62 = arith.constant 6.400000e+01 : f32
    %112 = vector.broadcast %cst_62 : f32 to vector<1x64xf32>
    %113 = arith.divf %111, %112 : vector<1x64xf32>
    %cst_63 = arith.constant 9.99999974E-6 : f32
    %114 = vector.broadcast %cst_63 : f32 to vector<1x64xf32>
    %115 = arith.addf %113, %114 : vector<1x64xf32>
    %116 = math.rsqrt %115 : vector<1x64xf32>
    %117 = arith.mulf %98, %116 : vector<1x64xf32>
    %118 = arith.mulf %106, %117 : vector<1x64xf32>
    %119 = arith.subf %99, %118 : vector<1x64xf32>
    %120 = vector.broadcast %117 : vector<1x64xf32> to vector<64x64xf32>
    %121 = arith.mulf %102, %120 : vector<64x64xf32>
    %122 = vector.broadcast %119 : vector<1x64xf32> to vector<64x64xf32>
    %123 = arith.addf %121, %122 : vector<64x64xf32>
    %cst_64 = arith.constant 0.000000e+00 : f32
    %124 = vector.broadcast %cst_64 : f32 to vector<64x64xf32>
    %125 = arith.maximumf %123, %124 : vector<64x64xf32>
    %c0_65 = arith.constant 0 : index
    %c0_66 = arith.constant 0 : index
    %126 = vector.load %arg19[%c0_65, %c0_66] : memref<64x32xf32, #tpu.memory_space<vmem>>, vector<64x32xf32>
    %c0_67 = arith.constant 0 : index
    %c0_68 = arith.constant 0 : index
    %127 = vector.load %arg20[%c0_67, %c0_68] : memref<1x32xf32, #tpu.memory_space<vmem>>, vector<1x32xf32>
    %c0_69 = arith.constant 0 : index
    %c0_70 = arith.constant 0 : index
    %128 = vector.load %arg21[%c0_69, %c0_70] : memref<1x32xf32, #tpu.memory_space<vmem>>, vector<1x32xf32>
    %c0_71 = arith.constant 0 : index
    %c0_72 = arith.constant 0 : index
    %129 = vector.load %arg22[%c0_71, %c0_72] : memref<1x32xf32, #tpu.memory_space<vmem>>, vector<1x32xf32>
    %cst_73 = arith.constant dense<0.000000e+00> : vector<64x32xf32>
    %130 = tpu.matmul %125, %126, %cst_73 {dimension_numbers = #tpu.dot_dimension_numbers<[1], [0], [0], [1], [0, 0, 1, 1], [], []>} : vector<64x64xf32>, vector<64x32xf32>, vector<64x32xf32> -> vector<64x32xf32>
    %131 = vector.broadcast %127 : vector<1x32xf32> to vector<64x32xf32>
    %132 = arith.addf %130, %131 : vector<64x32xf32>
    %cst_74 = arith.constant dense<0.000000e+00> : vector<32xf32>
    %133 = vector.multi_reduction <add>, %132, %cst_74 [0] : vector<64x32xf32> to vector<32xf32>
    %134 = vector.shape_cast %133 : vector<32xf32> to vector<1x32xf32>
    %cst_75 = arith.constant 6.400000e+01 : f32
    %135 = vector.broadcast %cst_75 : f32 to vector<1x32xf32>
    %136 = arith.divf %134, %135 : vector<1x32xf32>
    %137 = vector.broadcast %136 : vector<1x32xf32> to vector<64x32xf32>
    %138 = arith.subf %132, %137 : vector<64x32xf32>
    %139 = arith.mulf %138, %138 : vector<64x32xf32>
    %cst_76 = arith.constant dense<0.000000e+00> : vector<32xf32>
    %140 = vector.multi_reduction <add>, %139, %cst_76 [0] : vector<64x32xf32> to vector<32xf32>
    %141 = vector.shape_cast %140 : vector<32xf32> to vector<1x32xf32>
    %cst_77 = arith.constant 6.400000e+01 : f32
    %142 = vector.broadcast %cst_77 : f32 to vector<1x32xf32>
    %143 = arith.divf %141, %142 : vector<1x32xf32>
    %cst_78 = arith.constant 9.99999974E-6 : f32
    %144 = vector.broadcast %cst_78 : f32 to vector<1x32xf32>
    %145 = arith.addf %143, %144 : vector<1x32xf32>
    %146 = math.rsqrt %145 : vector<1x32xf32>
    %147 = arith.mulf %128, %146 : vector<1x32xf32>
    %148 = arith.mulf %136, %147 : vector<1x32xf32>
    %149 = arith.subf %129, %148 : vector<1x32xf32>
    %150 = vector.broadcast %147 : vector<1x32xf32> to vector<64x32xf32>
    %151 = arith.mulf %132, %150 : vector<64x32xf32>
    %152 = vector.broadcast %149 : vector<1x32xf32> to vector<64x32xf32>
    %153 = arith.addf %151, %152 : vector<64x32xf32>
    %cst_79 = arith.constant 0.000000e+00 : f32
    %154 = vector.broadcast %cst_79 : f32 to vector<64x32xf32>
    %155 = arith.maximumf %153, %154 : vector<64x32xf32>
    %c0_80 = arith.constant 0 : index
    %c0_81 = arith.constant 0 : index
    %156 = vector.load %arg23[%c0_80, %c0_81] : memref<32x32xf32, #tpu.memory_space<vmem>>, vector<32x32xf32>
    %c0_82 = arith.constant 0 : index
    %c0_83 = arith.constant 0 : index
    %157 = vector.load %arg24[%c0_82, %c0_83] : memref<1x32xf32, #tpu.memory_space<vmem>>, vector<1x32xf32>
    %c0_84 = arith.constant 0 : index
    %c0_85 = arith.constant 0 : index
    %158 = vector.load %arg25[%c0_84, %c0_85] : memref<1x32xf32, #tpu.memory_space<vmem>>, vector<1x32xf32>
    %c0_86 = arith.constant 0 : index
    %c0_87 = arith.constant 0 : index
    %159 = vector.load %arg26[%c0_86, %c0_87] : memref<1x32xf32, #tpu.memory_space<vmem>>, vector<1x32xf32>
    %cst_88 = arith.constant dense<0.000000e+00> : vector<64x32xf32>
    %160 = tpu.matmul %155, %156, %cst_88 {dimension_numbers = #tpu.dot_dimension_numbers<[1], [0], [0], [1], [0, 0, 1, 1], [], []>} : vector<64x32xf32>, vector<32x32xf32>, vector<64x32xf32> -> vector<64x32xf32>
    %161 = vector.broadcast %157 : vector<1x32xf32> to vector<64x32xf32>
    %162 = arith.addf %160, %161 : vector<64x32xf32>
    %cst_89 = arith.constant dense<0.000000e+00> : vector<32xf32>
    %163 = vector.multi_reduction <add>, %162, %cst_89 [0] : vector<64x32xf32> to vector<32xf32>
    %164 = vector.shape_cast %163 : vector<32xf32> to vector<1x32xf32>
    %cst_90 = arith.constant 6.400000e+01 : f32
    %165 = vector.broadcast %cst_90 : f32 to vector<1x32xf32>
    %166 = arith.divf %164, %165 : vector<1x32xf32>
    %167 = vector.broadcast %166 : vector<1x32xf32> to vector<64x32xf32>
    %168 = arith.subf %162, %167 : vector<64x32xf32>
    %169 = arith.mulf %168, %168 : vector<64x32xf32>
    %cst_91 = arith.constant dense<0.000000e+00> : vector<32xf32>
    %170 = vector.multi_reduction <add>, %169, %cst_91 [0] : vector<64x32xf32> to vector<32xf32>
    %171 = vector.shape_cast %170 : vector<32xf32> to vector<1x32xf32>
    %cst_92 = arith.constant 6.400000e+01 : f32
    %172 = vector.broadcast %cst_92 : f32 to vector<1x32xf32>
    %173 = arith.divf %171, %172 : vector<1x32xf32>
    %cst_93 = arith.constant 9.99999974E-6 : f32
    %174 = vector.broadcast %cst_93 : f32 to vector<1x32xf32>
    %175 = arith.addf %173, %174 : vector<1x32xf32>
    %176 = math.rsqrt %175 : vector<1x32xf32>
    %177 = arith.mulf %158, %176 : vector<1x32xf32>
    %178 = arith.mulf %166, %177 : vector<1x32xf32>
    %179 = arith.subf %159, %178 : vector<1x32xf32>
    %180 = vector.broadcast %177 : vector<1x32xf32> to vector<64x32xf32>
    %181 = arith.mulf %162, %180 : vector<64x32xf32>
    %182 = vector.broadcast %179 : vector<1x32xf32> to vector<64x32xf32>
    %183 = arith.addf %181, %182 : vector<64x32xf32>
    %cst_94 = arith.constant 0.000000e+00 : f32
    %184 = vector.broadcast %cst_94 : f32 to vector<64x32xf32>
    %185 = arith.maximumf %183, %184 : vector<64x32xf32>
    %c0_95 = arith.constant 0 : index
    %c0_96 = arith.constant 0 : index
    %186 = vector.load %arg27[%c0_95, %c0_96] : memref<32x64xf32, #tpu.memory_space<vmem>>, vector<32x64xf32>
    %cst_97 = arith.constant dense<0.000000e+00> : vector<64x64xf32>
    %187 = tpu.matmul %185, %186, %cst_97 {dimension_numbers = #tpu.dot_dimension_numbers<[1], [0], [0], [1], [0, 0, 1, 1], [], []>} : vector<64x32xf32>, vector<32x64xf32>, vector<64x64xf32> -> vector<64x64xf32>
    %c0_98 = arith.constant 0 : index
    %c0_99 = arith.constant 0 : index
    %188 = vector.load %arg28[%c0_98, %c0_99] : memref<1x64xf32, #tpu.memory_space<vmem>>, vector<1x64xf32>
    %189 = vector.broadcast %188 : vector<1x64xf32> to vector<64x64xf32>
    %190 = arith.addf %187, %189 : vector<64x64xf32>
    %c0_100 = arith.constant 0 : index
    %c0_101 = arith.constant 0 : index
    %191 = vector.load %arg29[%c0_100, %c0_101] : memref<64x64xf32, #tpu.memory_space<vmem>>, vector<64x64xf32>
    tpu.vector_store %arg29[%c0_100, %c0_101], %190 {strides = array<i32>} : memref<64x64xf32, #tpu.memory_space<vmem>>, vector<64x64xf32>,
    %c0_102 = arith.constant 0 : index
    %c0_103 = arith.constant 0 : index
    %192 = vector.load %arg30[%c0_102, %c0_103] : memref<64x32xf32, #tpu.memory_space<vmem>>, vector<64x32xf32>
    tpu.vector_store %arg30[%c0_102, %c0_103], %30 {strides = array<i32>} : memref<64x32xf32, #tpu.memory_space<vmem>>, vector<64x32xf32>,
    %c0_104 = arith.constant 0 : index
    %c0_105 = arith.constant 0 : index
    %193 = vector.load %arg31[%c0_104, %c0_105] : memref<64x32xf32, #tpu.memory_space<vmem>>, vector<64x32xf32>
    tpu.vector_store %arg31[%c0_104, %c0_105], %60 {strides = array<i32>} : memref<64x32xf32, #tpu.memory_space<vmem>>, vector<64x32xf32>,
    %c0_106 = arith.constant 0 : index
    %c0_107 = arith.constant 0 : index
    %194 = vector.load %arg32[%c0_106, %c0_107] : memref<64x64xf32, #tpu.memory_space<vmem>>, vector<64x64xf32>
    tpu.vector_store %arg32[%c0_106, %c0_107], %90 {strides = array<i32>} : memref<64x64xf32, #tpu.memory_space<vmem>>, vector<64x64xf32>,
    %c0_108 = arith.constant 0 : index
    %c0_109 = arith.constant 0 : index
    %195 = vector.load %arg33[%c0_108, %c0_109] : memref<64x16xf32, #tpu.memory_space<vmem>>, vector<64x16xf32>
    tpu.vector_store %arg33[%c0_108, %c0_109], %95 {strides = array<i32>} : memref<64x16xf32, #tpu.memory_space<vmem>>, vector<64x16xf32>,
    %c0_110 = arith.constant 0 : index
    %c0_111 = arith.constant 0 : index
    %196 = vector.load %arg34[%c0_110, %c0_111] : memref<64x32xf32, #tpu.memory_space<vmem>>, vector<64x32xf32>
    tpu.vector_store %arg34[%c0_110, %c0_111], %185 {strides = array<i32>} : memref<64x32xf32, #tpu.memory_space<vmem>>, vector<64x32xf32>,
    return
  }
}

</mosaic_0001>

<bundles_post_ra>
// kernel: ae_forward.1
= control target key start
LH: loop header
LB: loop body
LE: loop exit
PB: predicated region body
PF: predicated region fallthrough
CT: control target
= control target key end

     0   :  { %s2485_s6 = smov 1   ;;  %s2486_s10 = smov 2   ;;  %s3260_s0 = inlined_call_operand.smem [shape: u32[35], index: -1, kind: input, shape index: {}] }
   0x1   :  { %s2531_s5 = sld [smem:[%s3260_s0]]   ;;  %s2487_s14 = smov 3  }
   0x2   :  { %s2536_s9 = sld [smem:[%s3260_s0 + %s2485_s6]]   ;;  %s2488_s18 = smov 4  }
   0x3   :  { %s2541_s13 = sld [smem:[%s3260_s0 + %s2486_s10]]   ;;  %s2489_s22 = smov 5  }
   0x4   :  { %s2546_s17 = sld [smem:[%s3260_s0 + %s2487_s14]]   ;;  %s2490_s26 = smov 6  }
   0x5   :  { %s2551_s21 = sld [smem:[%s3260_s0 + %s2488_s18]]   ;;  %s2491_s30 = smov 7  }
   0x6   :  { %s2556_s25 = sld [smem:[%s3260_s0 + %s2489_s22]]   ;;  %s2492_s4 = smov 8  }
   0x7   :  { %s2561_s29 = sld [smem:[%s3260_s0 + %s2490_s26]]   ;;  %s2493_s10 = smov 9  }
   0x8   :  { %s2566_s3 = sld [smem:[%s3260_s0 + %s2491_s30]]   ;;  %s2494_s15 = smov 10  }
   0x9   :  { %s2571_s8 = sld [smem:[%s3260_s0 + %s2492_s4]]   ;;  %s2495_s20 = smov 11  }
   0xa   :  { %s2576_s14 = sld [smem:[%s3260_s0 + %s2493_s10]]   ;;  %s2496_s26 = smov 12  }
   0xb   :  { %s2581_s19 = sld [smem:[%s3260_s0 + %s2494_s15]]   ;;  %s2497_s1 = smov 13  }
   0xc   :  { %s2586_s24 = sld [smem:[%s3260_s0 + %s2495_s20]]   ;;  %s2498_s7 = smov 14  }
   0xd   :  { %s2591_s30 = sld [smem:[%s3260_s0 + %s2496_s26]]   ;;  %s2499_s15 = smov 15  }
   0xe   :  { %s2596_s6 = sld [smem:[%s3260_s0 + %s2497_s1]]   ;;  %s2500_s22 = smov 16  }
   0xf   :  { %s2601_s12 = sld [smem:[%s3260_s0 + %s2498_s7]]   ;;  %s2501_s28 = smov 17  }
  0x10   :  { %s2606_s20 = sld [smem:[%s3260_s0 + %s2499_s15]]   ;;  %s2502_s7 = smov 18  }
  0x11   :  { %s2611_s27 = sld [smem:[%s3260_s0 + %s2500_s22]]   ;;  %s2503_s15 = smov 19  }
  0x12   :  { %3264 = sst [smem:[#allocation8_spill]] %s2586_s24  ;;  %s2504_s22 = smov 20  }
  0x13   :  { %3265 = sst [smem:[#allocation9_spill]] %s2591_s30 }
  0x14   :  { %s2616_s4 = sld [smem:[%s3260_s0 + %s2501_s28]]   ;;  %s2505_s28 = smov 21  }
  0x15   :  { %3266 = sst [smem:[#allocation10_spill]] %s2601_s12 }
  0x16   :  { %s2621_s12 = sld [smem:[%s3260_s0 + %s2502_s7]]   ;;  %s2506_s7 = smov 22  }
  0x17   :  { %3267 = sst [smem:[#allocation11_spill]] %s2611_s27 }
  0x18   :  { %s2626_s30 = sld [smem:[%s3260_s0 + %s2503_s15]]   ;;  %s2507_s15 = smov 23  }
  0x19   :  { %s2631_s27 = sld [smem:[%s3260_s0 + %s2504_s22]]   ;;  %s2508_s22 = smov 24  }
  0x1a   :  { %3268 = sst [smem:[#allocation12_spill]] %s2616_s4 }
  0x1b   :  { %s2636_s4 = sld [smem:[%s3260_s0 + %s2505_s28]]   ;;  %s2509_s28 = smov 25  }
  0x1c   :  { %3269 = sst [smem:[#allocation13_spill]] %s2621_s12 }
  0x1d   :  { %s2641_s12 = sld [smem:[%s3260_s0 + %s2506_s7]]   ;;  %s2510_s7 = smov 26  }
  0x1e   :  { %3270 = sst [smem:[#allocation14_spill]] %s2626_s30 }
  0x1f   :  { %3271 = sst [smem:[#allocation15_spill]] %s2631_s27 }
  0x20   :  { %s2646_s30 = sld [smem:[%s3260_s0 + %s2507_s15]]   ;;  %s2511_s15 = smov 27  }
  0x21   :  { %3272 = sst [smem:[#allocation16_spill]] %s2636_s4 }
  0x22   :  { %s2651_s27 = sld [smem:[%s3260_s0 + %s2508_s22]]   ;;  %s2512_s22 = smov 28  }
  0x23   :  { %3273 = sst [smem:[#allocation17_spill]] %s2641_s12 }
  0x24   :  { %s2656_s4 = sld [smem:[%s3260_s0 + %s2509_s28]]   ;;  %s2513_s28 = smov 29  }
  0x25   :  { %s2661_s12 = sld [smem:[%s3260_s0 + %s2510_s7]]   ;;  %s2514_s7 = smov 30  }
  0x26   :  { %3274 = sst [smem:[#allocation18_spill]] %s2646_s30 }
  0x27   :  { %s2666_s30 = sld [smem:[%s3260_s0 + %s2511_s15]]   ;;  %s2515_s15 = smov 31  }
  0x28   :  { %3275 = sst [smem:[#allocation19_spill]] %s2651_s27 }
  0x29   :  { %s2671_s27 = sld [smem:[%s3260_s0 + %s2512_s22]]   ;;  %s2516_s22 = smov 32  }
  0x2a   :  { %3276 = sst [smem:[#allocation20_spill]] %s2656_s4 }
  0x2b   :  { %3277 = sst [smem:[#allocation21_spill]] %s2661_s12 }
  0x2c   :  { %s2676_s4 = sld [smem:[%s3260_s0 + %s2513_s28]]   ;;  %s2517_s28 = smov 33  }
  0x2d   :  { %3278 = sst [smem:[#allocation22_spill]] %s2666_s30 }
  0x2e   :  { %s2681_s12 = sld [smem:[%s3260_s0 + %s2514_s7]]   ;;  %s2518_s7 = smov 34  }
  0x2f   :  { %3279 = sst [smem:[#allocation23_spill]] %s2671_s27 }
  0x30   :  { %s2686_s30 = sld [smem:[%s3260_s0 + %s2515_s15]]  }
  0x31   :  { %s2691_s27 = sld [smem:[%s3260_s0 + %s2516_s22]]  }
  0x32   :  { %3280 = sst [smem:[#allocation24_spill]] %s2676_s4 }
  0x33   :  { %s2696_s4 = sld [smem:[%s3260_s0 + %s2517_s28]]  }
  0x34   :  { %s2701_s24 = sld [smem:[%s3260_s0 + %s2518_s7]]  }
  0x35   :  { %75 = vsyncpa [#allocation3], 0  ;;  %v150_v0 = vld [vmem:[%s2536_s9 + $0x38] sm:$0xff]  ;;  %v149_v1 = vld [vmem:[%s2536_s9 + $0x30] sm:$0xff]  ;;  %vm160_vm0 = vcmask 523264  }
  0x36   :  { %2203 = vmatprep.subr.mxu0 %v150_v0  ;;  %v148_v2 = vld [vmem:[%s2536_s9 + $0x28] sm:$0xff]  ;;  %v135_v3 = vld [vmem:[%s2531_s5] sm:$0xff] }
  0x37   :  { %2204 = vmatpush3.msra.mxu0 %v150_v0  ;;  %2219 = vmatprep.mubr.msk.f32.mxu0 %vm160_vm0, %v135_v3  ;;  %v147_v4 = vld [vmem:[%s2536_s9 + $0x20] sm:$0xff] }
  0x38   :  { %2205 = vmatprep.subr.mxu0 %v149_v1 }
  0x39   :  { %2206 = vmatpush3.msra.mxu0 %v149_v1 }
  0x3a   :  { %2207 = vmatprep.subr.mxu0 %v148_v2 }
  0x3b   :  { %76 = vsyncpa [#allocation5], 0  ;;  %2208 = vmatpush3.msra.mxu0 %v148_v2  ;;  %v146_v5 = vld [vmem:[%s2536_s9 + $0x18] sm:$0xff]  ;;  %v145_v6 = vld [vmem:[%s2536_s9 + $0x10] sm:$0xff]  ;;  %vm290_vm1 = vcmask 261120   ;;  %s3281_s0 = sld [smem:[#allocation8_spill]] }
  0x3c   :  { %2209 = vmatprep.subr.mxu0 %v147_v4  ;;  %v144_v7 = vld [vmem:[%s2536_s9 + $0x8] sm:$0xff]  ;;  %v143_v8 = vld [vmem:[%s2536_s9] sm:$0xff]  ;;  %v137_v10 = vld [vmem:[%s2531_s5 + $0x10] sm:$0xff]  ;;  %s3283_s9 = sld [smem:[#allocation10_spill]]  ;;  %vm1034_vm2 = vcmask 130048  }
  0x3d   :  { %2210 = vmatpush3.msra.mxu0 %v147_v4  ;;  %v136_v9 = vld [vmem:[%s2531_s5 + $0x8] sm:$0xff]  ;;  %v138_v11 = vld [vmem:[%s2531_s5 + $0x18] sm:$0xff]  ;;  %v139_v12 = vld [vmem:[%s2531_s5 + $0x20] sm:$0xff] }
  0x3e   :  { %2211 = vmatprep.subr.mxu0 %v146_v5  ;;  %v140_v13 = vld [vmem:[%s2531_s5 + $0x28] sm:$0xff]  ;;  %v141_v14 = vld [vmem:[%s2531_s5 + $0x30] sm:$0xff]  ;;  %v142_v15 = vld [vmem:[%s2531_s5 + $0x38] sm:$0xff]  ;;  %s3282_s5 = sld [smem:[#allocation9_spill]] }
  0x3f   :  { %2212 = vmatpush3.msra.mxu0 %v146_v5  ;;  %v396_v16 = vld [vmem:[%s2556_s25 + $0x18] sm:$0xff]  ;;  %v395_v17 = vld [vmem:[%s2556_s25 + $0x10] sm:$0xff]  ;;  %v394_v18 = vld [vmem:[%s2556_s25 + $0x8] sm:$0xff] }
  0x40   :  { %2213 = vmatprep.subr.mxu0 %v145_v6  ;;  %2231 = vmatprep.subr.mxu1 %v396_v16  ;;  %v393_v19 = vld [vmem:[%s2556_s25] sm:$0xff]  ;;  %s3287_s25 = sld [smem:[#allocation13_spill]] }
  0x41   :  { %2214 = vmatpush3.msra.mxu0 %v145_v6  ;;  %2232 = vmatpush3.msra.mxu1 %v396_v16  ;;  %v2025_v21 = vld [vmem:[%s2541_s13] ss:$0 sm:$0xff]  ;;  %s3284_s13 = sld [smem:[#allocation14_spill]] }
  0x42   :  { %2215 = vmatprep.subr.mxu0 %v144_v7  ;;  %2233 = vmatprep.subr.mxu1 %v395_v17 }
  0x43   :  { %2216 = vmatpush3.msra.mxu0 %v144_v7  ;;  %2234 = vmatpush3.msra.mxu1 %v395_v17 }
  0x44   :  { %2217 = vmatprep.subr.mxu0 %v143_v8  ;;  %2235 = vmatprep.subr.mxu1 %v394_v18 }
  0x45   :  { %2218 = vmatpush3.msra.mxu0 %v143_v8  ;;  %2236 = vmatpush3.msra.mxu1 %v394_v18 }
  0x46   :  { %2220 = vmatmul.mubr.msk.f32.vlgmr.msra.gmra.mxu0 %vm160_vm0, %v136_v9  ;;  %2237 = vmatprep.subr.mxu1 %v393_v19 }
  0x47   :  { %2222 = vmatprep.mubr.msk.f32.mxu0 %vm160_vm0, %v137_v10  ;;  %2238 = vmatpush3.msra.mxu1 %v393_v19 }
  0x4a   :  { %2223 = vmatmul.mubr.msk.f32.gmra.mxu0 %vm160_vm0, %v138_v11 }
  0x4b   :  { %2225 = vmatprep.mubr.msk.f32.mxu0 %vm160_vm0, %v139_v12 }
  0x4e   :  { %2226 = vmatmul.mubr.msk.f32.gmra.mxu0 %vm160_vm0, %v140_v13 }
  0x4f   :  { %2228 = vmatprep.mubr.msk.f32.mxu0 %vm160_vm0, %v141_v14 }
  0x52   :  { %2229 = vmatmul.mubr.msk.f32.gmra.mxu0 %vm160_vm0, %v142_v15 }
 0x106   :  { %v2221_v20 = vpop.f32.mrf.mxu0 }
 0x107   :  { %v2732_v23 = vadd.f32 %v2221_v20, %v2025_v21 }
 0x108   :  { %v251_v22 = vpop.f32.mrf.mxu0 }
 0x109   :  { %v2734_v24 = vadd.f32 %v2025_v21, %v251_v22  ;;  %v292_v28 = vsel %vm290_vm1, %v2732_v23, 0.0 }
 0x10a   :  { %v2224_v25 = vpop.f32.mrf.mxu0 }
 0x10b   :  { %v291_v26 = vsel %vm290_vm1, %v2734_v24, 0.0  ;;  %v2740_v29 = vadd.f32 %v2224_v25, %v2025_v21 }
 0x10c   :  { %v261_v27 = vpop.f32.mrf.mxu0  ;;  %v293_v31 = vadd.f32 %v292_v28, %v291_v26 }
 0x10d   :  { %v2742_v30 = vadd.f32 %v2025_v21, %v261_v27  ;;  %v296_v36 = vsel %vm290_vm1, %v2740_v29, 0.0 }
 0x10e   :  { %v2227_v32 = vpop.f32.mrf.mxu0 }
 0x10f   :  { %v294_v33 = vsel %vm290_vm1, %v2742_v30, 0.0  ;;  %v2748_v37 = vadd.f32 %v2227_v32, %v2025_v21 }
 0x110   :  { %v295_v34 = vadd.f32 %v294_v33, %v293_v31  ;;  %v271_v35 = vpop.f32.mrf.mxu0 }
 0x111   :  { %v2750_v38 = vadd.f32 %v2025_v21, %v271_v35  ;;  %v300_v44 = vsel %vm290_vm1, %v2748_v37, 0.0 }
 0x112   :  { %v297_v39 = vadd.f32 %v296_v36, %v295_v34  ;;  %v2230_v40 = vpop.f32.mrf.mxu0 }
 0x113   :  { %v298_v41 = vsel %vm290_vm1, %v2750_v38, 0.0  ;;  %v2756_v45 = vadd.f32 %v2230_v40, %v2025_v21  ;;  %v358_v40 = vlaneseq }
 0x114   :  { %v299_v42 = vadd.f32 %v298_v41, %v297_v39  ;;  %v281_v43 = vpop.f32.mrf.mxu0 }
 0x115   :  { %v2758_v46 = vadd.f32 %v2025_v21, %v281_v43  ;;  %v304_v50 = vsel %vm290_vm1, %v2756_v45, 0.0  ;;  %v359_v41 = vshrl.u32 %v358_v40, 7 }
 0x116   :  { %v301_v47 = vadd.f32 %v300_v44, %v299_v42  ;;  %v152_v42 = vld [vmem:[%s2546_s17] sm:$0x1]  ;;  %s3285_s17 = sld [smem:[#allocation11_spill]] }
 0x117   :  { %v302_v48 = vsel %vm290_vm1, %v2758_v46, 0.0  ;;  %v2781_v43 = vsub.s32 0, %v359_v41 }
 0x118   :  { %v303_v49 = vadd.f32 %v302_v48, %v301_v47  ;;  %v153_v48 = vld [vmem:[%s2551_s21] sm:$0x1]  ;;  %s3286_s21 = sld [smem:[#allocation12_spill]] }
 0x11a   :  { %v305_v51 = vadd.f32 %v304_v50, %v303_v49 }
 0x11c   :  { %v306_v52 = vrot.slane %v305_v51, 4 }
 0x11e   :  { %v307_v53 = vadd.f32 %v306_v52, %v305_v51 }
 0x120   :  { %v308_v54 = vrot.slane %v307_v53, 2 }
 0x122   :  { %v309_v55 = vadd.f32 %v308_v54, %v307_v53 }
 0x124   :  { %v310_v56 = vrot.slane %v309_v55, 1 }
 0x126   :  { %v311_v57 = vadd.f32 %v310_v56, %v309_v55 }
 0x128   :  { %v313_v58 = vmul.f32 0.015625, %v311_v57 }
 0x12a   :  { %v314_v59 = vsub.f32 %v2734_v24, %v313_v58  ;;  %v315_v60 = vsub.f32 %v2732_v23, %v313_v58  ;;  %v316_v61 = vsub.f32 %v2742_v30, %v313_v58  ;;  %v317_v62 = vsub.f32 %v2740_v29, %v313_v58 }
 0x12b   :  { %v318_v63 = vsub.f32 %v2750_v38, %v313_v58  ;;  %v319_v3 = vsub.f32 %v2748_v37, %v313_v58  ;;  %v320_v8 = vsub.f32 %v2758_v46, %v313_v58  ;;  %v321_v12 = vsub.f32 %v2756_v45, %v313_v58 }
 0x12c   :  { %v322_v0 = vmul.f32 %v314_v59, %v314_v59  ;;  %v323_v1 = vmul.f32 %v315_v60, %v315_v60  ;;  %v324_v2 = vmul.f32 %v316_v61, %v316_v61  ;;  %v325_v4 = vmul.f32 %v317_v62, %v317_v62 }
 0x12d   :  { %v326_v9 = vmul.f32 %v318_v63, %v318_v63  ;;  %v327_v13 = vmul.f32 %v319_v3, %v319_v3  ;;  %v328_v16 = vmul.f32 %v320_v8, %v320_v8  ;;  %v329_v19 = vmul.f32 %v321_v12, %v321_v12  ;;  %v636_v8 = vld [vmem:[%s2576_s14] sm:$0xff] }
 0x12e   :  { %v330_v5 = vsel %vm290_vm1, %v322_v0, 0.0  ;;  %v331_v6 = vsel %vm290_vm1, %v323_v1, 0.0  ;;  %v333_v10 = vsel %vm290_vm1, %v324_v2, 0.0  ;;  %v335_v14 = vsel %vm290_vm1, %v325_v4, 0.0 }
 0x12f   :  { %v332_v7 = vadd.f32 %v331_v6, %v330_v5  ;;  %v337_v17 = vsel %vm290_vm1, %v326_v9, 0.0  ;;  %v339_v20 = vsel %vm290_vm1, %v327_v13, 0.0  ;;  %v341_v22 = vsel %vm290_vm1, %v328_v16, 0.0  ;;  %v639_v5 = vld [vmem:[%s2576_s14 + $0x18] sm:$0xff]  ;;  %v638_v6 = vld [vmem:[%s2576_s14 + $0x10] sm:$0xff] }
 0x130   :  { %v343_v26 = vsel %vm290_vm1, %v329_v19, 0.0  ;;  %2251 = vmatprep.subr.mxu1 %v639_v5 }
 0x131   :  { %v334_v11 = vadd.f32 %v333_v10, %v332_v7  ;;  %v637_v7 = vld [vmem:[%s2576_s14 + $0x8] sm:$0xff]  ;;  %v2034_v10 = vld [vmem:[%s2561_s29] ss:$0 sm:$0xff]  ;;  %s3288_s29 = sld [smem:[#allocation18_spill]] }
 0x132   :  { %s3291_s14 = sld [smem:[#allocation17_spill]] }
 0x133   :  { %v336_v15 = vadd.f32 %v335_v14, %v334_v11 }
 0x135   :  { %v338_v18 = vadd.f32 %v337_v17, %v336_v15 }
 0x137   :  { %v340_v21 = vadd.f32 %v339_v20, %v338_v18 }
 0x139   :  { %v342_v25 = vadd.f32 %v341_v22, %v340_v21 }
 0x13b   :  { %v344_v27 = vadd.f32 %v343_v26, %v342_v25 }
 0x13d   :  { %v345_v28 = vrot.slane %v344_v27, 4 }
 0x13f   :  { %v346_v31 = vadd.f32 %v345_v28, %v344_v27 }
 0x141   :  { %v347_v32 = vrot.slane %v346_v31, 2 }
 0x143   :  { %v348_v33 = vadd.f32 %v347_v32, %v346_v31 }
 0x145   :  { %v349_v34 = vrot.slane %v348_v33, 1 }
 0x147   :  { %v350_v35 = vadd.f32 %v349_v34, %v348_v33 }
 0x149   :  { %v351_v36 = vmul.f32 0.015625, %v350_v35 }
 0x14b   :  { %v352_v39 = vadd.f32 1e-05, %v351_v36 }
 0x14d   :  { %2429 = vrsqrt.f32 %v352_v39 }
 0x15a   :  { %v2430_v44 = vpop.eup %2429 }
 0x15b   :  { %v354_v47 = vmul.f32 %v2430_v44, %v152_v42 }
 0x15d   :  { %v355_v49 = vmul.f32 %v354_v47, %v313_v58  ;;  %v361_v50 = vrot.slane %v354_v47, %v2781_v43 }
 0x15f   :  { %v356_v51 = vsub.f32 %v153_v48, %v355_v49  ;;  %v369_v52 = vmul.f32 %v361_v50, %v2758_v46  ;;  %v363_v54 = vmul.f32 %v361_v50, %v2734_v24  ;;  %v364_v55 = vmul.f32 %v361_v50, %v2732_v23 }
 0x160   :  { %v365_v56 = vmul.f32 %v361_v50, %v2742_v30  ;;  %v366_v57 = vmul.f32 %v361_v50, %v2740_v29  ;;  %v367_v59 = vmul.f32 %v361_v50, %v2750_v38  ;;  %v368_v60 = vmul.f32 %v361_v50, %v2748_v37 }
 0x161   :  { %v375_v53 = vrot.slane %v356_v51, %v2781_v43  ;;  %v370_v58 = vmul.f32 %v361_v50, %v2756_v45 }
 0x163   :  { %v383_v61 = vadd.f32 %v375_v53, %v369_v52  ;;  %v377_v62 = vadd.f32 %v375_v53, %v363_v54  ;;  %v378_v46 = vadd.f32 %v375_v53, %v364_v55  ;;  %v379_v63 = vadd.f32 %v375_v53, %v365_v56 }
 0x164   :  { %v380_v24 = vadd.f32 %v375_v53, %v366_v57  ;;  %v381_v23 = vadd.f32 %v375_v53, %v367_v59  ;;  %v382_v0 = vadd.f32 %v375_v53, %v368_v60  ;;  %v384_v30 = vadd.f32 %v375_v53, %v370_v58 }
 0x165   :  { %v385_v29 = vmax.f32 %v377_v62, 0.0  ;;  %v386_v38 = vmax.f32 %v378_v46, 0.0  ;;  %v387_v37 = vmax.f32 %v379_v63, 0.0  ;;  %v391_v45 = vmax.f32 %v383_v61, 0.0 }
 0x166   :  { %v388_v1 = vmax.f32 %v380_v24, 0.0  ;;  %v389_v2 = vmax.f32 %v381_v23, 0.0  ;;  %v390_v3 = vmax.f32 %v382_v0, 0.0  ;;  %v392_v4 = vmax.f32 %v384_v30, 0.0 }
 0x167   :  { %2239 = vmatprep.mubr.msk.f32.mxu1 %vm290_vm1, %v385_v29  ;;  %1903 = vst.msk [vmem:[%s2681_s12] sm:$0xff] %vm290_vm1, %v385_v29  ;;  %1904 = vst.msk [vmem:[%s2681_s12 + $0x8] sm:$0xff] %vm290_vm1, %v386_v38 }
 0x168   :  { %1905 = vst.msk [vmem:[%s2681_s12 + $0x10] sm:$0xff] %vm290_vm1, %v387_v37  ;;  %1909 = vst.msk [vmem:[%s2681_s12 + $0x30] sm:$0xff] %vm290_vm1, %v391_v45  ;;  %2240 = vmatmul.mubr.msk.f32.vlgmr.msra.gmra.mxu1 %vm290_vm1, %v386_v38 }
 0x169   :  { %1906 = vst.msk [vmem:[%s2681_s12 + $0x18] sm:$0xff] %vm290_vm1, %v388_v1  ;;  %1907 = vst.msk [vmem:[%s2681_s12 + $0x20] sm:$0xff] %vm290_vm1, %v389_v2  ;;  %2242 = vmatprep.mubr.msk.f32.mxu1 %vm290_vm1, %v387_v37  ;;  %2252 = vmatpush3.msra.mxu1 %v639_v5 }
 0x16a   :  { %1908 = vst.msk [vmem:[%s2681_s12 + $0x28] sm:$0xff] %vm290_vm1, %v390_v3  ;;  %1910 = vst.msk [vmem:[%s2681_s12 + $0x38] sm:$0xff] %vm290_vm1, %v392_v4  ;;  %2253 = vmatprep.subr.mxu1 %v638_v6  ;;  %s3295_s12 = sld [smem:[#allocation21_spill]] }
 0x16b   :  { %2254 = vmatpush3.msra.mxu1 %v638_v6 }
 0x16c   :  { %2243 = vmatmul.mubr.msk.f32.gmra.mxu1 %vm290_vm1, %v388_v1  ;;  %2255 = vmatprep.subr.mxu1 %v637_v7 }
 0x16d   :  { %2245 = vmatprep.mubr.msk.f32.mxu1 %vm290_vm1, %v389_v2  ;;  %2256 = vmatpush3.msra.mxu1 %v637_v7 }
 0x16e   :  { %2257 = vmatprep.subr.mxu1 %v636_v8 }
 0x16f   :  { %2258 = vmatpush3.msra.mxu1 %v636_v8 }
 0x170   :  { %2246 = vmatmul.mubr.msk.f32.gmra.mxu1 %vm290_vm1, %v390_v3 }
 0x171   :  { %2248 = vmatprep.mubr.msk.f32.mxu1 %vm290_vm1, %v391_v45 }
 0x174   :  { %2249 = vmatmul.mubr.msk.f32.gmra.mxu1 %vm290_vm1, %v392_v4 }
 0x228   :  { %v2241_v9 = vpop.f32.mrf.mxu1 }
 0x229   :  { %v2823_v12 = vadd.f32 %v2241_v9, %v2034_v10 }
 0x22a   :  { %v496_v11 = vpop.f32.mrf.mxu1 }
 0x22b   :  { %v2825_v13 = vadd.f32 %v2034_v10, %v496_v11  ;;  %v536_v17 = vsel %vm290_vm1, %v2823_v12, 0.0 }
 0x22c   :  { %v2244_v14 = vpop.f32.mrf.mxu1 }
 0x22d   :  { %v535_v15 = vsel %vm290_vm1, %v2825_v13, 0.0  ;;  %v2831_v18 = vadd.f32 %v2244_v14, %v2034_v10 }
 0x22e   :  { %v506_v16 = vpop.f32.mrf.mxu1  ;;  %v537_v20 = vadd.f32 %v536_v17, %v535_v15 }
 0x22f   :  { %v2833_v19 = vadd.f32 %v2034_v10, %v506_v16  ;;  %v540_v27 = vsel %vm290_vm1, %v2831_v18, 0.0 }
 0x230   :  { %v2247_v21 = vpop.f32.mrf.mxu1 }
 0x231   :  { %v538_v22 = vsel %vm290_vm1, %v2833_v19, 0.0  ;;  %v2839_v28 = vadd.f32 %v2247_v21, %v2034_v10 }
 0x232   :  { %v539_v25 = vadd.f32 %v538_v22, %v537_v20  ;;  %v516_v26 = vpop.f32.mrf.mxu1 }
 0x233   :  { %v2841_v31 = vadd.f32 %v2034_v10, %v516_v26  ;;  %v544_v39 = vsel %vm290_vm1, %v2839_v28, 0.0 }
 0x234   :  { %v541_v32 = vadd.f32 %v540_v27, %v539_v25  ;;  %v2250_v33 = vpop.f32.mrf.mxu1 }
 0x235   :  { %v542_v34 = vsel %vm290_vm1, %v2841_v31, 0.0  ;;  %v2847_v40 = vadd.f32 %v2250_v33, %v2034_v10 }
 0x236   :  { %v543_v35 = vadd.f32 %v542_v34, %v541_v32  ;;  %v526_v36 = vpop.f32.mrf.mxu1  ;;  %v398_v34 = vld [vmem:[%s2566_s3] sm:$0x1]  ;;  %s3289_s3 = sld [smem:[#allocation15_spill]] }
 0x237   :  { %v527_v41 = vadd.f32 %v2034_v10, %v526_v36  ;;  %v548_v48 = vsel %vm290_vm1, %v2847_v40, 0.0 }
 0x238   :  { %v545_v42 = vadd.f32 %v544_v39, %v543_v35  ;;  %v399_v39 = vld [vmem:[%s2571_s8] sm:$0x1]  ;;  %s3290_s8 = sld [smem:[#allocation16_spill]] }
 0x239   :  { %v546_v44 = vsel %vm290_vm1, %v527_v41, 0.0 }
 0x23a   :  { %v547_v47 = vadd.f32 %v546_v44, %v545_v42 }
 0x23c   :  { %v549_v49 = vadd.f32 %v548_v48, %v547_v47 }
 0x23e   :  { %v550_v50 = vrot.slane %v549_v49, 4 }
 0x240   :  { %v551_v51 = vadd.f32 %v550_v50, %v549_v49 }
 0x242   :  { %v552_v52 = vrot.slane %v551_v51, 2 }
 0x244   :  { %v553_v53 = vadd.f32 %v552_v52, %v551_v51 }
 0x246   :  { %v554_v54 = vrot.slane %v553_v53, 1 }
 0x248   :  { %v555_v55 = vadd.f32 %v554_v54, %v553_v53 }
 0x24a   :  { %v556_v56 = vmul.f32 0.015625, %v555_v55 }
 0x24c   :  { %v557_v57 = vsub.f32 %v2825_v13, %v556_v56  ;;  %v558_v59 = vsub.f32 %v2823_v12, %v556_v56  ;;  %v559_v60 = vsub.f32 %v2833_v19, %v556_v56  ;;  %v560_v58 = vsub.f32 %v2831_v18, %v556_v56 }
 0x24d   :  { %v561_v61 = vsub.f32 %v2841_v31, %v556_v56  ;;  %v562_v24 = vsub.f32 %v2839_v28, %v556_v56  ;;  %v563_v38 = vsub.f32 %v527_v41, %v556_v56  ;;  %v564_v2 = vsub.f32 %v2847_v40, %v556_v56 }
 0x24e   :  { %v565_v62 = vmul.f32 %v557_v57, %v557_v57  ;;  %v566_v46 = vmul.f32 %v558_v59, %v558_v59  ;;  %v567_v63 = vmul.f32 %v559_v60, %v559_v60  ;;  %v568_v23 = vmul.f32 %v560_v58, %v560_v58 }
 0x24f   :  { %v569_v37 = vmul.f32 %v561_v61, %v561_v61  ;;  %v570_v3 = vmul.f32 %v562_v24, %v562_v24  ;;  %v571_v6 = vmul.f32 %v563_v38, %v563_v38  ;;  %v572_v9 = vmul.f32 %v564_v2, %v564_v2  ;;  %v886_v24 = vld [vmem:[%s2596_s6 + $0x38] sm:$0xff]  ;;  %v881_v38 = vld [vmem:[%s2596_s6 + $0x10] sm:$0xff]  ;;  %v1023_v2 = vld [vmem:[%s2606_s20] sm:$0xff] }
 0x250   :  { %v573_v0 = vsel %vm290_vm1, %v565_v62, 0.0  ;;  %v574_v30 = vsel %vm290_vm1, %v566_v46, 0.0  ;;  %v576_v45 = vsel %vm290_vm1, %v567_v63, 0.0  ;;  %v578_v4 = vsel %vm290_vm1, %v568_v23, 0.0  ;;  %2271 = vmatprep.subr.mxu0 %v886_v24  ;;  %v885_v23 = vld [vmem:[%s2596_s6 + $0x30] sm:$0xff] }
 0x251   :  { %v575_v29 = vadd.f32 %v574_v30, %v573_v0  ;;  %v580_v7 = vsel %vm290_vm1, %v569_v37, 0.0  ;;  %v582_v10 = vsel %vm290_vm1, %v570_v3, 0.0  ;;  %v584_v14 = vsel %vm290_vm1, %v571_v6, 0.0  ;;  %2272 = vmatpush3.msra.mxu0 %v886_v24  ;;  %v884_v0 = vld [vmem:[%s2596_s6 + $0x28] sm:$0xff]  ;;  %v883_v30 = vld [vmem:[%s2596_s6 + $0x20] sm:$0xff] }
 0x252   :  { %v586_v16 = vsel %vm290_vm1, %v572_v9, 0.0  ;;  %2273 = vmatprep.subr.mxu0 %v885_v23  ;;  %v880_v37 = vld [vmem:[%s2596_s6 + $0x8] sm:$0xff] }
 0x253   :  { %v577_v1 = vadd.f32 %v576_v45, %v575_v29  ;;  %2274 = vmatpush3.msra.mxu0 %v885_v23  ;;  %v882_v29 = vld [vmem:[%s2596_s6 + $0x18] sm:$0xff]  ;;  %v879_v45 = vld [vmem:[%s2596_s6] sm:$0xff]  ;;  %s3294_s6 = sld [smem:[#allocation20_spill]] }
 0x254   :  { %2275 = vmatprep.subr.mxu0 %v884_v0 }
 0x255   :  { %v579_v5 = vadd.f32 %v578_v4, %v577_v1  ;;  %2276 = vmatpush3.msra.mxu0 %v884_v0  ;;  %v1024_v1 = vld [vmem:[%s2606_s20 + $0x8] sm:$0xff]  ;;  %v2043_v4 = vld [vmem:[%s2581_s19] ss:$0 sm:$0xff]  ;;  %s3292_s19 = sld [smem:[#allocation22_spill]]  ;;  %s2519_s20 = smov [#allocation4]  }
 0x256   :  { %2277 = vmatprep.subr.mxu0 %v883_v30  ;;  %2299 = vmatprep.subr.mxu1 %v1024_v1 }
 0x257   :  { %v581_v8 = vadd.f32 %v580_v7, %v579_v5  ;;  %2278 = vmatpush3.msra.mxu0 %v883_v30 }
 0x258   :  { %2279 = vmatprep.subr.mxu0 %v882_v29 }
 0x259   :  { %v583_v11 = vadd.f32 %v582_v10, %v581_v8  ;;  %2280 = vmatpush3.msra.mxu0 %v882_v29 }
 0x25a   :  { %2281 = vmatprep.subr.mxu0 %v881_v38 }
 0x25b   :  { %v585_v15 = vadd.f32 %v584_v14, %v583_v11  ;;  %2282 = vmatpush3.msra.mxu0 %v881_v38 }
 0x25c   :  { %2283 = vmatprep.subr.mxu0 %v880_v37 }
 0x25d   :  { %v587_v17 = vadd.f32 %v586_v16, %v585_v15  ;;  %2284 = vmatpush3.msra.mxu0 %v880_v37 }
 0x25e   :  { %2285 = vmatprep.subr.mxu0 %v879_v45 }
 0x25f   :  { %v588_v20 = vrot.slane %v587_v17, 4  ;;  %2286 = vmatpush3.msra.mxu0 %v879_v45 }
 0x261   :  { %v589_v21 = vadd.f32 %v588_v20, %v587_v17 }
 0x263   :  { %v590_v22 = vrot.slane %v589_v21, 2 }
 0x265   :  { %v591_v25 = vadd.f32 %v590_v22, %v589_v21 }
 0x267   :  { %v592_v26 = vrot.slane %v591_v25, 1 }
 0x269   :  { %v593_v27 = vadd.f32 %v592_v26, %v591_v25 }
 0x26b   :  { %v594_v32 = vmul.f32 0.015625, %v593_v27 }
 0x26d   :  { %v595_v33 = vadd.f32 1e-05, %v594_v32 }
 0x26f   :  { %2431 = vrsqrt.f32 %v595_v33 }
 0x27c   :  { %v2432_v35 = vpop.eup %2431 }
 0x27d   :  { %v597_v36 = vmul.f32 %v2432_v35, %v398_v34 }
 0x27f   :  { %v598_v42 = vmul.f32 %v597_v36, %v556_v56  ;;  %v604_v44 = vrot.slane %v597_v36, %v2781_v43 }
 0x281   :  { %v599_v47 = vsub.f32 %v399_v39, %v598_v42  ;;  %v612_v48 = vmul.f32 %v604_v44, %v527_v41  ;;  %v606_v50 = vmul.f32 %v604_v44, %v2825_v13  ;;  %v607_v51 = vmul.f32 %v604_v44, %v2823_v12 }
 0x282   :  { %v608_v52 = vmul.f32 %v604_v44, %v2833_v19  ;;  %v609_v53 = vmul.f32 %v604_v44, %v2831_v18  ;;  %v610_v54 = vmul.f32 %v604_v44, %v2841_v31  ;;  %v611_v55 = vmul.f32 %v604_v44, %v2839_v28 }
 0x283   :  { %v618_v49 = vrot.slane %v599_v47, %v2781_v43  ;;  %v613_v56 = vmul.f32 %v604_v44, %v2847_v40 }
 0x285   :  { %v626_v57 = vadd.f32 %v618_v49, %v612_v48  ;;  %v620_v59 = vadd.f32 %v618_v49, %v606_v50  ;;  %v621_v41 = vadd.f32 %v618_v49, %v607_v51  ;;  %v622_v60 = vadd.f32 %v618_v49, %v608_v52 }
 0x286   :  { %v623_v13 = vadd.f32 %v618_v49, %v609_v53  ;;  %v624_v12 = vadd.f32 %v618_v49, %v610_v54  ;;  %v625_v58 = vadd.f32 %v618_v49, %v611_v55  ;;  %v627_v19 = vadd.f32 %v618_v49, %v613_v56 }
 0x287   :  { %v628_v18 = vmax.f32 %v620_v59, 0.0  ;;  %v629_v31 = vmax.f32 %v621_v41, 0.0  ;;  %v630_v28 = vmax.f32 %v622_v60, 0.0  ;;  %v634_v40 = vmax.f32 %v626_v57, 0.0 }
 0x288   :  { %v631_v61 = vmax.f32 %v623_v13, 0.0  ;;  %v632_v62 = vmax.f32 %v624_v12, 0.0  ;;  %v633_v46 = vmax.f32 %v625_v58, 0.0  ;;  %v635_v63 = vmax.f32 %v627_v19, 0.0 }
 0x289   :  { %2259 = vmatprep.mubr.msk.f32.mxu1 %vm290_vm1, %v628_v18  ;;  %1911 = vst.msk [vmem:[%s2686_s30] sm:$0xff] %vm290_vm1, %v628_v18  ;;  %1912 = vst.msk [vmem:[%s2686_s30 + $0x8] sm:$0xff] %vm290_vm1, %v629_v31 }
 0x28a   :  { %1913 = vst.msk [vmem:[%s2686_s30 + $0x10] sm:$0xff] %vm290_vm1, %v630_v28  ;;  %1917 = vst.msk [vmem:[%s2686_s30 + $0x30] sm:$0xff] %vm290_vm1, %v634_v40  ;;  %2260 = vmatmul.mubr.msk.f32.vlgmr.msra.gmra.mxu1 %vm290_vm1, %v629_v31 }
 0x28b   :  { %1914 = vst.msk [vmem:[%s2686_s30 + $0x18] sm:$0xff] %vm290_vm1, %v631_v61  ;;  %1915 = vst.msk [vmem:[%s2686_s30 + $0x20] sm:$0xff] %vm290_vm1, %v632_v62  ;;  %2262 = vmatprep.mubr.msk.f32.mxu1 %vm290_vm1, %v630_v28  ;;  %2300 = vmatpush3.msra.mxu1 %v1024_v1 }
 0x28c   :  { %1916 = vst.msk [vmem:[%s2686_s30 + $0x28] sm:$0xff] %vm290_vm1, %v633_v46  ;;  %1918 = vst.msk [vmem:[%s2686_s30 + $0x38] sm:$0xff] %vm290_vm1, %v635_v63  ;;  %2301 = vmatprep.subr.mxu1 %v1023_v2  ;;  %s3293_s30 = sld [smem:[#allocation19_spill]] }
 0x28d   :  { %2302 = vmatpush3.msra.mxu1 %v1023_v2 }
 0x28e   :  { %2263 = vmatmul.mubr.msk.f32.gmra.mxu1 %vm290_vm1, %v631_v61 }
 0x28f   :  { %2265 = vmatprep.mubr.msk.f32.mxu1 %vm290_vm1, %v632_v62 }
 0x292   :  { %2266 = vmatmul.mubr.msk.f32.gmra.mxu1 %vm290_vm1, %v633_v46 }
 0x293   :  { %2268 = vmatprep.mubr.msk.f32.mxu1 %vm290_vm1, %v634_v40 }
 0x296   :  { %2269 = vmatmul.mubr.msk.f32.gmra.mxu1 %vm290_vm1, %v635_v63 }
 0x34a   :  { %v2261_v3 = vpop.f32.mrf.mxu1 }
 0x34b   :  { %v2913_v6 = vadd.f32 %v2261_v3, %v2043_v4 }
 0x34c   :  { %v739_v5 = vpop.f32.mrf.mxu1 }
 0x34d   :  { %v2915_v7 = vadd.f32 %v2043_v4, %v739_v5  ;;  %v779_v11 = vsel %vm160_vm0, %v2913_v6, 0.0 }
 0x34e   :  { %v2264_v8 = vpop.f32.mrf.mxu1 }
 0x34f   :  { %v778_v9 = vsel %vm160_vm0, %v2915_v7, 0.0  ;;  %v2921_v14 = vadd.f32 %v2264_v8, %v2043_v4 }
 0x350   :  { %v749_v10 = vpop.f32.mrf.mxu1  ;;  %v780_v16 = vadd.f32 %v779_v11, %v778_v9 }
 0x351   :  { %v2923_v15 = vadd.f32 %v2043_v4, %v749_v10  ;;  %v783_v25 = vsel %vm160_vm0, %v2921_v14, 0.0 }
 0x352   :  { %v2267_v17 = vpop.f32.mrf.mxu1 }
 0x353   :  { %v781_v20 = vsel %vm160_vm0, %v2923_v15, 0.0  ;;  %v2929_v26 = vadd.f32 %v2267_v17, %v2043_v4 }
 0x354   :  { %v782_v21 = vadd.f32 %v781_v20, %v780_v16  ;;  %v759_v22 = vpop.f32.mrf.mxu1 }
 0x355   :  { %v2931_v27 = vadd.f32 %v2043_v4, %v759_v22  ;;  %v787_v39 = vsel %vm160_vm0, %v2929_v26, 0.0 }
 0x356   :  { %v784_v32 = vadd.f32 %v783_v25, %v782_v21  ;;  %v2270_v33 = vpop.f32.mrf.mxu1 }
 0x357   :  { %v785_v34 = vsel %vm160_vm0, %v2931_v27, 0.0  ;;  %v2937_v42 = vadd.f32 %v2270_v33, %v2043_v4 }
 0x358   :  { %v786_v35 = vadd.f32 %v785_v34, %v784_v32  ;;  %v769_v36 = vpop.f32.mrf.mxu1  ;;  %v641_v34 = vld [vmem:[%s3281_s0] sm:$0x1] }
 0x359   :  { %v770_v44 = vadd.f32 %v2043_v4, %v769_v36  ;;  %v791_v50 = vsel %vm160_vm0, %v2937_v42, 0.0 }
 0x35a   :  { %v788_v47 = vadd.f32 %v787_v39, %v786_v35  ;;  %v642_v39 = vld [vmem:[%s3282_s5] sm:$0x1] }
 0x35b   :  { %v789_v48 = vsel %vm160_vm0, %v770_v44, 0.0 }
 0x35c   :  { %v790_v49 = vadd.f32 %v789_v48, %v788_v47 }
 0x35e   :  { %v792_v51 = vadd.f32 %v791_v50, %v790_v49 }
 0x360   :  { %v793_v52 = vrot.slane %v792_v51, 4 }
 0x362   :  { %v794_v53 = vadd.f32 %v793_v52, %v792_v51 }
 0x364   :  { %v795_v54 = vrot.slane %v794_v53, 2 }
 0x366   :  { %v796_v55 = vadd.f32 %v795_v54, %v794_v53 }
 0x368   :  { %v797_v56 = vrot.slane %v796_v55, 1 }
 0x36a   :  { %v798_v57 = vadd.f32 %v797_v56, %v796_v55 }
 0x36c   :  { %v799_v59 = vmul.f32 0.015625, %v798_v57 }
 0x36e   :  { %v800_v41 = vsub.f32 %v2915_v7, %v799_v59  ;;  %v801_v60 = vsub.f32 %v2913_v6, %v799_v59  ;;  %v802_v13 = vsub.f32 %v2923_v15, %v799_v59  ;;  %v803_v12 = vsub.f32 %v2921_v14, %v799_v59 }
 0x36f   :  { %v804_v58 = vsub.f32 %v2931_v27, %v799_v59  ;;  %v805_v28 = vsub.f32 %v2929_v26, %v799_v59  ;;  %v806_v63 = vsub.f32 %v770_v44, %v799_v59  ;;  %v807_v30 = vsub.f32 %v2937_v42, %v799_v59 }
 0x370   :  { %v808_v19 = vmul.f32 %v800_v41, %v800_v41  ;;  %v809_v18 = vmul.f32 %v801_v60, %v801_v60  ;;  %v810_v31 = vmul.f32 %v802_v13, %v802_v13  ;;  %v811_v40 = vmul.f32 %v803_v12, %v803_v12 }
 0x371   :  { %v812_v24 = vmul.f32 %v804_v58, %v804_v58  ;;  %v813_v29 = vmul.f32 %v805_v28, %v805_v28  ;;  %v814_v45 = vmul.f32 %v806_v63, %v806_v63  ;;  %v815_v3 = vmul.f32 %v807_v30, %v807_v30 }
 0x372   :  { %v816_v61 = vsel %vm160_vm0, %v808_v19, 0.0  ;;  %v817_v62 = vsel %vm160_vm0, %v809_v18, 0.0  ;;  %v819_v23 = vsel %vm160_vm0, %v810_v31, 0.0  ;;  %v821_v38 = vsel %vm160_vm0, %v811_v40, 0.0 }
 0x373   :  { %v818_v46 = vadd.f32 %v817_v62, %v816_v61  ;;  %v823_v1 = vsel %vm160_vm0, %v812_v24, 0.0  ;;  %v825_v4 = vsel %vm160_vm0, %v813_v29, 0.0  ;;  %v827_v8 = vsel %vm160_vm0, %v814_v45, 0.0 }
 0x374   :  { %v829_v10 = vsel %vm160_vm0, %v815_v3, 0.0 }
 0x375   :  { %v820_v0 = vadd.f32 %v819_v23, %v818_v46 }
 0x377   :  { %v822_v37 = vadd.f32 %v821_v38, %v820_v0 }
 0x379   :  { %v824_v2 = vadd.f32 %v823_v1, %v822_v37 }
 0x37b   :  { %v826_v5 = vadd.f32 %v825_v4, %v824_v2  ;;  %v1272_v4 = vld [vmem:[%s3284_s13 + $0x38] sm:$0xff] }
 0x37c   :  { %2315 = vmatprep.subr.mxu0 %v1272_v4 }
 0x37d   :  { %v828_v9 = vadd.f32 %v827_v8, %v826_v5  ;;  %v1271_v5 = vld [vmem:[%s3284_s13 + $0x30] sm:$0xff]  ;;  %v1270_v8 = vld [vmem:[%s3284_s13 + $0x28] sm:$0xff] }
 0x37f   :  { %v830_v11 = vadd.f32 %v829_v10, %v828_v9  ;;  %v1269_v9 = vld [vmem:[%s3284_s13 + $0x20] sm:$0xff]  ;;  %v1268_v10 = vld [vmem:[%s3284_s13 + $0x18] sm:$0xff] }
 0x381   :  { %v831_v16 = vrot.slane %v830_v11, 4 }
 0x383   :  { %v832_v17 = vadd.f32 %v831_v16, %v830_v11  ;;  %v1267_v11 = vld [vmem:[%s3284_s13 + $0x10] sm:$0xff]  ;;  %v1266_v16 = vld [vmem:[%s3284_s13 + $0x8] sm:$0xff] }
 0x385   :  { %v833_v20 = vrot.slane %v832_v17, 2 }
 0x387   :  { %v834_v21 = vadd.f32 %v833_v20, %v832_v17  ;;  %v1265_v17 = vld [vmem:[%s3284_s13] sm:$0xff] }
 0x389   :  { %v835_v22 = vrot.slane %v834_v21, 1 }
 0x38b   :  { %v836_v25 = vadd.f32 %v835_v22, %v834_v21  ;;  %v2061_v21 = vld [vmem:[%s3285_s17] ss:$0 sm:$0xff] }
 0x38d   :  { %v837_v32 = vmul.f32 0.015625, %v836_v25 }
 0x38f   :  { %v838_v33 = vadd.f32 1e-05, %v837_v32 }
 0x391   :  { %2433 = vrsqrt.f32 %v838_v33 }
 0x39e   :  { %v2434_v35 = vpop.eup %2433 }
 0x39f   :  { %v840_v36 = vmul.f32 %v2434_v35, %v641_v34 }
 0x3a1   :  { %v841_v47 = vmul.f32 %v840_v36, %v799_v59  ;;  %v847_v48 = vrot.slane %v840_v36, %v2781_v43 }
 0x3a3   :  { %v842_v49 = vsub.f32 %v642_v39, %v841_v47  ;;  %v855_v50 = vmul.f32 %v847_v48, %v770_v44  ;;  %v849_v52 = vmul.f32 %v847_v48, %v2915_v7  ;;  %v850_v53 = vmul.f32 %v847_v48, %v2913_v6 }
 0x3a4   :  { %v851_v54 = vmul.f32 %v847_v48, %v2923_v15  ;;  %v852_v55 = vmul.f32 %v847_v48, %v2921_v14  ;;  %v853_v56 = vmul.f32 %v847_v48, %v2931_v27  ;;  %v854_v57 = vmul.f32 %v847_v48, %v2929_v26  ;;  %v2052_v26 = vld [vmem:[%s3283_s9] ss:$0 sm:$0xff] }
 0x3a5   :  { %v861_v51 = vrot.slane %v842_v49, %v2781_v43  ;;  %v856_v59 = vmul.f32 %v847_v48, %v2937_v42 }
 0x3a7   :  { %v869_v41 = vadd.f32 %v861_v51, %v855_v50  ;;  %v863_v60 = vadd.f32 %v861_v51, %v849_v52  ;;  %v864_v13 = vadd.f32 %v861_v51, %v850_v53  ;;  %v865_v44 = vadd.f32 %v861_v51, %v851_v54 }
 0x3a8   :  { %v866_v12 = vadd.f32 %v861_v51, %v852_v55  ;;  %v867_v58 = vadd.f32 %v861_v51, %v853_v56  ;;  %v868_v19 = vadd.f32 %v861_v51, %v854_v57  ;;  %v870_v7 = vadd.f32 %v861_v51, %v856_v59 }
 0x3a9   :  { %v871_v18 = vmax.f32 %v863_v60, 0.0  ;;  %v872_v6 = vmax.f32 %v864_v13, 0.0  ;;  %v873_v31 = vmax.f32 %v865_v44, 0.0  ;;  %v877_v15 = vmax.f32 %v869_v41, 0.0 }
 0x3aa   :  { %v874_v28 = vmax.f32 %v866_v12, 0.0  ;;  %v875_v14 = vmax.f32 %v867_v58, 0.0  ;;  %v876_v40 = vmax.f32 %v868_v19, 0.0  ;;  %v878_v27 = vmax.f32 %v870_v7, 0.0 }
 0x3ab   :  { %2287 = vmatprep.mubr.msk.f32.mxu0 %vm160_vm0, %v871_v18  ;;  %1919 = vst.msk [vmem:[#allocation4] sm:$0xff] %vm160_vm0, %v871_v18  ;;  %1920 = vst.msk [vmem:[#allocation4 + $0x8] sm:$0xff] %vm160_vm0, %v872_v6 }
 0x3ac   :  { %1921 = vst.msk [vmem:[#allocation4 + $0x10] sm:$0xff] %vm160_vm0, %v873_v31  ;;  %1925 = vst.msk [vmem:[#allocation4 + $0x30] sm:$0xff] %vm160_vm0, %v877_v15  ;;  %2288 = vmatmul.mubr.msk.f32.vlgmr.msra.gmra.mxu0 %vm160_vm0, %v872_v6 }
 0x3ad   :  { %1922 = vst.msk [vmem:[#allocation4 + $0x18] sm:$0xff] %vm160_vm0, %v874_v28  ;;  %1923 = vst.msk [vmem:[#allocation4 + $0x20] sm:$0xff] %vm160_vm0, %v875_v14  ;;  %2290 = vmatprep.mubr.msk.f32.mxu0 %vm160_vm0, %v873_v31  ;;  %2316 = vmatpush3.msra.mxu0 %v1272_v4 }
 0x3ae   :  { %1924 = vst.msk [vmem:[#allocation4 + $0x28] sm:$0xff] %vm160_vm0, %v876_v40  ;;  %1926 = vst.msk [vmem:[#allocation4 + $0x38] sm:$0xff] %vm160_vm0, %v878_v27  ;;  %2317 = vmatprep.subr.mxu0 %v1271_v5 }
 0x3af   :  { %2318 = vmatpush3.msra.mxu0 %v1271_v5 }
 0x3b0   :  { %2291 = vmatmul.mubr.msk.f32.gmra.mxu0 %vm160_vm0, %v874_v28  ;;  %2319 = vmatprep.subr.mxu0 %v1270_v8 }
 0x3b1   :  { %2293 = vmatprep.mubr.msk.f32.mxu0 %vm160_vm0, %v875_v14  ;;  %2320 = vmatpush3.msra.mxu0 %v1270_v8 }
 0x3b2   :  { %2321 = vmatprep.subr.mxu0 %v1269_v9 }
 0x3b3   :  { %2322 = vmatpush3.msra.mxu0 %v1269_v9 }
 0x3b4   :  { %2294 = vmatmul.mubr.msk.f32.gmra.mxu0 %vm160_vm0, %v876_v40  ;;  %2323 = vmatprep.subr.mxu0 %v1268_v10 }
 0x3b5   :  { %2296 = vmatprep.mubr.msk.f32.mxu0 %vm160_vm0, %v877_v15  ;;  %2324 = vmatpush3.msra.mxu0 %v1268_v10 }
 0x3b6   :  { %2325 = vmatprep.subr.mxu0 %v1267_v11 }
 0x3b7   :  { %2326 = vmatpush3.msra.mxu0 %v1267_v11 }
 0x3b8   :  { %2297 = vmatmul.mubr.msk.f32.gmra.mxu0 %vm160_vm0, %v878_v27  ;;  %2327 = vmatprep.subr.mxu0 %v1266_v16 }
 0x3b9   :  { %2328 = vmatpush3.msra.mxu0 %v1266_v16 }
 0x3ba   :  { %2329 = vmatprep.subr.mxu0 %v1265_v17 }
 0x3bb   :  { %2330 = vmatpush3.msra.mxu0 %v1265_v17 }
 0x46c   :  { %v2289_v42 = vpop.f32.mrf.mxu0 }
 0x46d   :  { %v990_v61 = vadd.f32 %v2289_v42, %v2052_v26 }
 0x46e   :  { %v984_v62 = vpop.f32.mrf.mxu0 }
 0x46f   :  { %1928 = vst.msk [vmem:[%s2696_s4 + $0x8] sm:$0xff] %vm1034_vm2, %v990_v61  ;;  %v985_v46 = vadd.f32 %v2052_v26, %v984_v62 }
 0x470   :  { %v2292_v63 = vpop.f32.mrf.mxu0 }
 0x471   :  { %1927 = vst.msk [vmem:[%s2696_s4] sm:$0xff] %vm1034_vm2, %v985_v46  ;;  %v1000_v24 = vadd.f32 %v2292_v63, %v2052_v26  ;;  %2303 = vmatprep.mubr.msk.f32.mxu1 %vm1034_vm2, %v985_v46 }
 0x472   :  { %v994_v23 = vpop.f32.mrf.mxu0  ;;  %2304 = vmatmul.mubr.msk.f32.vlgmr.msra.gmra.mxu1 %vm1034_vm2, %v990_v61 }
 0x473   :  { %1930 = vst.msk [vmem:[%s2696_s4 + $0x18] sm:$0xff] %vm1034_vm2, %v1000_v24  ;;  %v995_v0 = vadd.f32 %v2052_v26, %v994_v23 }
 0x474   :  { %v2295_v30 = vpop.f32.mrf.mxu0 }
 0x475   :  { %1929 = vst.msk [vmem:[%s2696_s4 + $0x10] sm:$0xff] %vm1034_vm2, %v995_v0  ;;  %v1010_v29 = vadd.f32 %v2295_v30, %v2052_v26  ;;  %2306 = vmatprep.mubr.msk.f32.mxu1 %vm1034_vm2, %v995_v0 }
 0x476   :  { %v1004_v38 = vpop.f32.mrf.mxu0  ;;  %2307 = vmatmul.mubr.msk.f32.gmra.mxu1 %vm1034_vm2, %v1000_v24 }
 0x477   :  { %1932 = vst.msk [vmem:[%s2696_s4 + $0x28] sm:$0xff] %vm1034_vm2, %v1010_v29  ;;  %v1005_v37 = vadd.f32 %v2052_v26, %v1004_v38 }
 0x478   :  { %v2298_v45 = vpop.f32.mrf.mxu0 }
 0x479   :  { %1931 = vst.msk [vmem:[%s2696_s4 + $0x20] sm:$0xff] %vm1034_vm2, %v1005_v37  ;;  %v1020_v1 = vadd.f32 %v2298_v45, %v2052_v26  ;;  %2309 = vmatprep.mubr.msk.f32.mxu1 %vm1034_vm2, %v1005_v37 }
 0x47a   :  { %v1014_v2 = vpop.f32.mrf.mxu0  ;;  %2310 = vmatmul.mubr.msk.f32.gmra.mxu1 %vm1034_vm2, %v1010_v29 }
 0x47b   :  { %1934 = vst.msk [vmem:[%s2696_s4 + $0x38] sm:$0xff] %vm1034_vm2, %v1020_v1  ;;  %v1015_v3 = vadd.f32 %v2052_v26, %v1014_v2 }
 0x47d   :  { %1933 = vst.msk [vmem:[%s2696_s4 + $0x30] sm:$0xff] %vm1034_vm2, %v1015_v3  ;;  %2312 = vmatprep.mubr.msk.f32.mxu1 %vm1034_vm2, %v1015_v3  ;;  %s1964_s4 = sshll.u32 %s2519_s20, 4  ;;  %s1965_s4 = int_to_ptr.vmem [resolvable:$true] %s1964_s4 }
 0x47e   :  { %2313 = vmatmul.mubr.msk.f32.gmra.mxu1 %vm1034_vm2, %v1020_v1  ;;  %s2441_s15 = scalar_lea.vmem %s1965_s4, 1024  ;;  %p2446_p1 = scmp.lt.s32.totalorder %s1965_s4, %s1965_s4 }
 0x47f   :  { %p2442_p0 = scmp.ne.s32.totalorder %s1965_s4, %s2441_s15  ;;  %p2447_p2 = scmp.lt.s32.totalorder %s2441_s15, %s2441_s15 }
 0x481   :  { %p2448_p3 = por %p2447_p2, %p2446_p1 }
 0x483   :  { %p2449_p4 = pnand %p2448_p3, %p2442_p0 }
 0x532   :  { %v2305_v20 = vpop.f32.mrf.mxu1 }
 0x533   :  { %v3018_v25 = vadd.f32 %v2305_v20, %v2061_v21 }
 0x534   :  { %v1125_v22 = vpop.f32.mrf.mxu1 }
 0x535   :  { %v3020_v32 = vadd.f32 %v2061_v21, %v1125_v22  ;;  %v1165_v36 = vsel %vm160_vm0, %v3018_v25, 0.0 }
 0x536   :  { %v2308_v33 = vpop.f32.mrf.mxu1 }
 0x537   :  { %v1164_v34 = vsel %vm160_vm0, %v3020_v32, 0.0  ;;  %v3026_v39 = vadd.f32 %v2308_v33, %v2061_v21 }
 0x538   :  { %v1135_v35 = vpop.f32.mrf.mxu1  ;;  %v1166_v48 = vadd.f32 %v1165_v36, %v1164_v34 }
 0x539   :  { %v3028_v47 = vadd.f32 %v2061_v21, %v1135_v35  ;;  %v1169_v53 = vsel %vm160_vm0, %v3026_v39, 0.0 }
 0x53a   :  { %v2311_v49 = vpop.f32.mrf.mxu1 }
 0x53b   :  { %v1167_v50 = vsel %vm160_vm0, %v3028_v47, 0.0  ;;  %v3034_v54 = vadd.f32 %v2311_v49, %v2061_v21 }
 0x53c   :  { %v1168_v51 = vadd.f32 %v1167_v50, %v1166_v48  ;;  %v1145_v52 = vpop.f32.mrf.mxu1 }
 0x53d   :  { %v3036_v55 = vadd.f32 %v2061_v21, %v1145_v52  ;;  %v1173_v13 = vsel %vm160_vm0, %v3034_v54, 0.0 }
 0x53e   :  { %v1170_v56 = vadd.f32 %v1169_v53, %v1168_v51  ;;  %v2314_v57 = vpop.f32.mrf.mxu1 }
 0x53f   :  { %v1171_v59 = vsel %vm160_vm0, %v3036_v55, 0.0  ;;  %v3042_v44 = vadd.f32 %v2314_v57, %v2061_v21 }
 0x540   :  { %v1172_v41 = vadd.f32 %v1171_v59, %v1170_v56  ;;  %v1155_v60 = vpop.f32.mrf.mxu1  ;;  %v1026_v59 = vld [vmem:[%s3286_s21] sm:$0x1] }
 0x541   :  { %v3044_v12 = vadd.f32 %v2061_v21, %v1155_v60  ;;  %v1177_v18 = vsel %vm160_vm0, %v3042_v44, 0.0 }
 0x542   :  { %v1174_v58 = vadd.f32 %v1173_v13, %v1172_v41  ;;  %v1027_v13 = vld [vmem:[%s3287_s25] sm:$0x1] }
 0x543   :  { %v1175_v19 = vsel %vm160_vm0, %v3044_v12, 0.0 }
 0x544   :  { %v1176_v7 = vadd.f32 %v1175_v19, %v1174_v58 }
 0x546   :  { %v1178_v6 = vadd.f32 %v1177_v18, %v1176_v7 }
 0x548   :  { %v1179_v31 = vrot.slane %v1178_v6, 4 }
 0x54a   :  { %v1180_v15 = vadd.f32 %v1179_v31, %v1178_v6 }
 0x54c   :  { %v1181_v28 = vrot.slane %v1180_v15, 2 }
 0x54e   :  { %v1182_v14 = vadd.f32 %v1181_v28, %v1180_v15 }
 0x550   :  { %v1183_v40 = vrot.slane %v1182_v14, 1 }
 0x552   :  { %v1184_v27 = vadd.f32 %v1183_v40, %v1182_v14 }
 0x554   :  { %v1185_v26 = vmul.f32 0.015625, %v1184_v27 }
 0x556   :  { %v1186_v42 = vsub.f32 %v3020_v32, %v1185_v26  ;;  %v1187_v61 = vsub.f32 %v3018_v25, %v1185_v26  ;;  %v1188_v62 = vsub.f32 %v3028_v47, %v1185_v26  ;;  %v1189_v46 = vsub.f32 %v3026_v39, %v1185_v26 }
 0x557   :  { %v1190_v63 = vsub.f32 %v3036_v55, %v1185_v26  ;;  %v1191_v30 = vsub.f32 %v3034_v54, %v1185_v26  ;;  %v1192_v1 = vsub.f32 %v3044_v12, %v1185_v26  ;;  %v1193_v5 = vsub.f32 %v3042_v44, %v1185_v26 }
 0x558   :  { %v1194_v24 = vmul.f32 %v1186_v42, %v1186_v42  ;;  %v1195_v23 = vmul.f32 %v1187_v61, %v1187_v61  ;;  %v1196_v0 = vmul.f32 %v1188_v62, %v1188_v62  ;;  %v1197_v29 = vmul.f32 %v1189_v46, %v1189_v46 }
 0x559   :  { %v1198_v2 = vmul.f32 %v1190_v63, %v1190_v63  ;;  %v1199_v8 = vmul.f32 %v1191_v30, %v1191_v30  ;;  %v1200_v11 = vmul.f32 %v1192_v1, %v1192_v1  ;;  %v1201_v20 = vmul.f32 %v1193_v5, %v1193_v5  ;;  %v2070_v1 = vld [vmem:[%s3289_s3] ss:$0 sm:$0xff] }
 0x55a   :  { %v1202_v38 = vsel %vm160_vm0, %v1194_v24, 0.0  ;;  %v1203_v37 = vsel %vm160_vm0, %v1195_v23, 0.0  ;;  %v1205_v3 = vsel %vm160_vm0, %v1196_v0, 0.0  ;;  %v1207_v9 = vsel %vm160_vm0, %v1197_v29, 0.0  ;;  %v1515_v29 = vld [vmem:[%s3288_s29 + $0x18] sm:$0xff] }
 0x55b   :  { %v1204_v45 = vadd.f32 %v1203_v37, %v1202_v38  ;;  %v1209_v16 = vsel %vm160_vm0, %v1198_v2, 0.0  ;;  %v1211_v21 = vsel %vm160_vm0, %v1199_v8, 0.0  ;;  %v1213_v33 = vsel %vm160_vm0, %v1200_v11, 0.0  ;;  %2343 = vmatprep.subr.mxu1 %v1515_v29  ;;  %v1514_v38 = vld [vmem:[%s3288_s29 + $0x10] sm:$0xff]  ;;  %v1513_v37 = vld [vmem:[%s3288_s29 + $0x8] sm:$0xff] }
 0x55c   :  { %v1215_v35 = vsel %vm160_vm0, %v1201_v20, 0.0  ;;  %2344 = vmatpush3.msra.mxu1 %v1515_v29 }
 0x55d   :  { %v1206_v4 = vadd.f32 %v1205_v3, %v1204_v45  ;;  %2345 = vmatprep.subr.mxu1 %v1514_v38 }
 0x55e   :  { %2346 = vmatpush3.msra.mxu1 %v1514_v38 }
 0x55f   :  { %v1208_v10 = vadd.f32 %v1207_v9, %v1206_v4  ;;  %2347 = vmatprep.subr.mxu1 %v1513_v37 }
 0x560   :  { %2348 = vmatpush3.msra.mxu1 %v1513_v37 }
 0x561   :  { %v1210_v17 = vadd.f32 %v1209_v16, %v1208_v10 }
 0x563   :  { %v1212_v22 = vadd.f32 %v1211_v21, %v1210_v17 }
 0x565   :  { %v1214_v34 = vadd.f32 %v1213_v33, %v1212_v22 }
 0x567   :  { %v1216_v36 = vadd.f32 %v1215_v35, %v1214_v34 }
 0x569   :  { %v1217_v48 = vrot.slane %v1216_v36, 4 }
 0x56b   :  { %v1218_v49 = vadd.f32 %v1217_v48, %v1216_v36 }
 0x56d   :  { %v1219_v50 = vrot.slane %v1218_v49, 2 }
 0x56f   :  { %v1220_v51 = vadd.f32 %v1219_v50, %v1218_v49 }
 0x571   :  { %v1221_v52 = vrot.slane %v1220_v51, 1 }
 0x573   :  { %v1222_v53 = vadd.f32 %v1221_v52, %v1220_v51 }
 0x575   :  { %v1223_v56 = vmul.f32 0.015625, %v1222_v53 }
 0x577   :  { %v1224_v57 = vadd.f32 1e-05, %v1223_v56 }
 0x579   :  { %2435 = vrsqrt.f32 %v1224_v57 }
 0x586   :  { %v2436_v41 = vpop.eup %2435 }
 0x587   :  { %v1226_v60 = vmul.f32 %v2436_v41, %v1026_v59 }
 0x589   :  { %v1227_v58 = vmul.f32 %v1226_v60, %v1185_v26  ;;  %v1233_v19 = vrot.slane %v1226_v60, %v2781_v43 }
 0x58b   :  { %v1228_v7 = vsub.f32 %v1027_v13, %v1227_v58  ;;  %v1235_v6 = vmul.f32 %v1233_v19, %v3020_v32  ;;  %v1236_v31 = vmul.f32 %v1233_v19, %v3018_v25  ;;  %v1237_v15 = vmul.f32 %v1233_v19, %v3028_v47 }
 0x58c   :  { %v1238_v27 = vmul.f32 %v1233_v19, %v3026_v39  ;;  %v1239_v26 = vmul.f32 %v1233_v19, %v3036_v55  ;;  %v1240_v25 = vmul.f32 %v1233_v19, %v3034_v54  ;;  %v1241_v32 = vmul.f32 %v1233_v19, %v3044_v12 }
 0x58d   :  { %v1247_v18 = vrot.slane %v1228_v7, %v2781_v43  ;;  %v1242_v23 = vmul.f32 %v1233_v19, %v3042_v44  ;;  %v1512_v44 = vld [vmem:[%s3288_s29] sm:$0xff] }
 0x58e   :  { %2349 = vmatprep.subr.mxu1 %v1512_v44 }
 0x58f   :  { %v1249_v28 = vadd.f32 %v1247_v18, %v1235_v6  ;;  %v1250_v14 = vadd.f32 %v1247_v18, %v1236_v31  ;;  %v1251_v40 = vadd.f32 %v1247_v18, %v1237_v15  ;;  %v1252_v62 = vadd.f32 %v1247_v18, %v1238_v27  ;;  %2350 = vmatpush3.msra.mxu1 %v1512_v44 }
 0x590   :  { %v1253_v63 = vadd.f32 %v1247_v18, %v1239_v26  ;;  %v1254_v39 = vadd.f32 %v1247_v18, %v1240_v25  ;;  %v1255_v24 = vadd.f32 %v1247_v18, %v1241_v32  ;;  %v1256_v54 = vadd.f32 %v1247_v18, %v1242_v23 }
 0x591   :  { %v1257_v42 = vmax.f32 %v1249_v28, 0.0  ;;  %v1258_v61 = vmax.f32 %v1250_v14, 0.0  ;;  %v1259_v46 = vmax.f32 %v1251_v40, 0.0  ;;  %v1260_v47 = vmax.f32 %v1252_v62, 0.0 }
 0x592   :  { %v1261_v55 = vmax.f32 %v1253_v63, 0.0  ;;  %v1262_v0 = vmax.f32 %v1254_v39, 0.0  ;;  %v1263_v30 = vmax.f32 %v1255_v24, 0.0  ;;  %v1264_v12 = vmax.f32 %v1256_v54, 0.0 }
 0x593   :  { %2331 = vmatprep.mubr.msk.f32.mxu0 %vm160_vm0, %v1257_v42 }
 0x594   :  { %2332 = vmatmul.mubr.msk.f32.vlgmr.msra.gmra.mxu0 %vm160_vm0, %v1258_v61 }
 0x595   :  { %2334 = vmatprep.mubr.msk.f32.mxu0 %vm160_vm0, %v1259_v46 }
 0x598   :  { %2335 = vmatmul.mubr.msk.f32.gmra.mxu0 %vm160_vm0, %v1260_v47 }
 0x599   :  { %2337 = vmatprep.mubr.msk.f32.mxu0 %vm160_vm0, %v1261_v55 }
 0x59c   :  { %2338 = vmatmul.mubr.msk.f32.gmra.mxu0 %vm160_vm0, %v1262_v0 }
 0x59d   :  { %2340 = vmatprep.mubr.msk.f32.mxu0 %vm160_vm0, %v1263_v30 }
 0x5a0   :  { %2341 = vmatmul.mubr.msk.f32.gmra.mxu0 %vm160_vm0, %v1264_v12 }
 0x654   :  { %v2333_v45 = vpop.f32.mrf.mxu0 }
 0x655   :  { %v3091_v3 = vadd.f32 %v2333_v45, %v2070_v1 }
 0x656   :  { %v1372_v2 = vpop.f32.mrf.mxu0 }
 0x657   :  { %v3093_v4 = vadd.f32 %v2070_v1, %v1372_v2  ;;  %v1412_v10 = vsel %vm290_vm1, %v3091_v3, 0.0 }
 0x658   :  { %v2336_v5 = vpop.f32.mrf.mxu0 }
 0x659   :  { %v1411_v8 = vsel %vm290_vm1, %v3093_v4, 0.0  ;;  %v3099_v11 = vadd.f32 %v2336_v5, %v2070_v1 }
 0x65a   :  { %v1382_v9 = vpop.f32.mrf.mxu0  ;;  %v1413_v17 = vadd.f32 %v1412_v10, %v1411_v8 }
 0x65b   :  { %v3101_v16 = vadd.f32 %v2070_v1, %v1382_v9  ;;  %v1416_v34 = vsel %vm290_vm1, %v3099_v11, 0.0 }
 0x65c   :  { %v2339_v20 = vpop.f32.mrf.mxu0 }
 0x65d   :  { %v1414_v21 = vsel %vm290_vm1, %v3101_v16, 0.0  ;;  %v3107_v35 = vadd.f32 %v2339_v20, %v2070_v1 }
 0x65e   :  { %v1415_v22 = vadd.f32 %v1414_v21, %v1413_v17  ;;  %v1392_v33 = vpop.f32.mrf.mxu0 }
 0x65f   :  { %v3109_v36 = vadd.f32 %v2070_v1, %v1392_v33  ;;  %v1420_v53 = vsel %vm290_vm1, %v3107_v35, 0.0 }
 0x660   :  { %v1417_v48 = vadd.f32 %v1416_v34, %v1415_v22  ;;  %v2342_v49 = vpop.f32.mrf.mxu0 }
 0x661   :  { %v1418_v50 = vsel %vm290_vm1, %v3109_v36, 0.0  ;;  %v3115_v56 = vadd.f32 %v2342_v49, %v2070_v1 }
 0x662   :  { %v1419_v51 = vadd.f32 %v1418_v50, %v1417_v48  ;;  %v1402_v52 = vpop.f32.mrf.mxu0  ;;  %v1274_v50 = vld [vmem:[%s3290_s8] sm:$0x1] }
 0x663   :  { %v3117_v57 = vadd.f32 %v2070_v1, %v1402_v52  ;;  %v1424_v13 = vsel %vm290_vm1, %v3115_v56, 0.0 }
 0x664   :  { %v1421_v59 = vadd.f32 %v1420_v53, %v1419_v51  ;;  %v1275_v53 = vld [vmem:[%s3291_s14] sm:$0x1] }
 0x665   :  { %v1422_v41 = vsel %vm290_vm1, %v3117_v57, 0.0 }
 0x666   :  { %v1423_v60 = vadd.f32 %v1422_v41, %v1421_v59 }
 0x668   :  { %v1425_v58 = vadd.f32 %v1424_v13, %v1423_v60 }
 0x66a   :  { %v1426_v19 = vrot.slane %v1425_v58, 4 }
 0x66c   :  { %v1427_v7 = vadd.f32 %v1426_v19, %v1425_v58 }
 0x66e   :  { %v1428_v18 = vrot.slane %v1427_v7, 2 }
 0x670   :  { %v1429_v6 = vadd.f32 %v1428_v18, %v1427_v7 }
 0x672   :  { %v1430_v31 = vrot.slane %v1429_v6, 1 }
 0x674   :  { %v1431_v15 = vadd.f32 %v1430_v31, %v1429_v6 }
 0x676   :  { %v1432_v28 = vmul.f32 0.015625, %v1431_v15 }
 0x678   :  { %v1433_v14 = vsub.f32 %v3093_v4, %v1432_v28  ;;  %v1434_v40 = vsub.f32 %v3091_v3, %v1432_v28  ;;  %v1435_v27 = vsub.f32 %v3101_v16, %v1432_v28  ;;  %v1436_v42 = vsub.f32 %v3099_v11, %v1432_v28 }
 0x679   :  { %v1437_v61 = vsub.f32 %v3109_v36, %v1432_v28  ;;  %v1438_v63 = vsub.f32 %v3107_v35, %v1432_v28  ;;  %v1439_v24 = vsub.f32 %v3117_v57, %v1432_v28  ;;  %v1440_v54 = vsub.f32 %v3115_v56, %v1432_v28 }
 0x67a   :  { %v1441_v26 = vmul.f32 %v1433_v14, %v1433_v14  ;;  %v1442_v62 = vmul.f32 %v1434_v40, %v1434_v40  ;;  %v1443_v46 = vmul.f32 %v1435_v27, %v1435_v27  ;;  %v1444_v25 = vmul.f32 %v1436_v42, %v1436_v42 }
 0x67b   :  { %v1445_v55 = vmul.f32 %v1437_v61, %v1437_v61  ;;  %v1446_v30 = vmul.f32 %v1438_v63, %v1438_v63  ;;  %v1447_v38 = vmul.f32 %v1439_v24, %v1439_v24  ;;  %v1448_v45 = vmul.f32 %v1440_v54, %v1440_v54  ;;  %v2079_v24 = vld [vmem:[%s3293_s30] ss:$0 sm:$0xff] }
 0x67c   :  { %v1449_v32 = vsel %vm290_vm1, %v1441_v26, 0.0  ;;  %v1450_v47 = vsel %vm290_vm1, %v1442_v62, 0.0  ;;  %v1452_v23 = vsel %vm290_vm1, %v1443_v46, 0.0  ;;  %v1454_v12 = vsel %vm290_vm1, %v1444_v25, 0.0  ;;  %v1758_v25 = vld [vmem:[%s3292_s19 + $0x18] sm:$0xff] }
 0x67d   :  { %v1451_v39 = vadd.f32 %v1450_v47, %v1449_v32  ;;  %v1456_v37 = vsel %vm290_vm1, %v1445_v55, 0.0  ;;  %v1458_v1 = vsel %vm290_vm1, %v1446_v30, 0.0  ;;  %v1460_v5 = vsel %vm290_vm1, %v1447_v38, 0.0  ;;  %2363 = vmatprep.subr.mxu0 %v1758_v25  ;;  %2383 = vmatprep.subr.mxu1 %v1758_v25  ;;  %v1757_v32 = vld [vmem:[%s3292_s19 + $0x10] sm:$0xff]  ;;  %v1756_v47 = vld [vmem:[%s3292_s19 + $0x8] sm:$0xff] }
 0x67e   :  { %v1462_v9 = vsel %vm290_vm1, %v1448_v45, 0.0  ;;  %2364 = vmatpush3.msra.mxu0 %v1758_v25 }
 0x67f   :  { %v1453_v0 = vadd.f32 %v1452_v23, %v1451_v39  ;;  %2365 = vmatprep.subr.mxu0 %v1757_v32 }
 0x680   :  { %2366 = vmatpush3.msra.mxu0 %v1757_v32 }
 0x681   :  { %v1455_v29 = vadd.f32 %v1454_v12, %v1453_v0  ;;  %2367 = vmatprep.subr.mxu0 %v1756_v47 }
 0x682   :  { %2368 = vmatpush3.msra.mxu0 %v1756_v47 }
 0x683   :  { %v1457_v44 = vadd.f32 %v1456_v37, %v1455_v29 }
 0x685   :  { %v1459_v2 = vadd.f32 %v1458_v1, %v1457_v44 }
 0x687   :  { %v1461_v8 = vadd.f32 %v1460_v5, %v1459_v2 }
 0x689   :  { %v1463_v10 = vadd.f32 %v1462_v9, %v1461_v8 }
 0x68b   :  { %v1464_v17 = vrot.slane %v1463_v10, 4 }
 0x68d   :  { %v1465_v20 = vadd.f32 %v1464_v17, %v1463_v10 }
 0x68f   :  { %v1466_v21 = vrot.slane %v1465_v20, 2 }
 0x691   :  { %v1467_v22 = vadd.f32 %v1466_v21, %v1465_v20 }
 0x693   :  { %v1468_v33 = vrot.slane %v1467_v22, 1 }
 0x695   :  { %v1469_v34 = vadd.f32 %v1468_v33, %v1467_v22 }
 0x697   :  { %v1470_v48 = vmul.f32 0.015625, %v1469_v34 }
 0x699   :  { %v1471_v49 = vadd.f32 1e-05, %v1470_v48 }
 0x69b   :  { %2437 = vrsqrt.f32 %v1471_v49 }
 0x6a8   :  { %v2438_v51 = vpop.eup %2437 }
 0x6a9   :  { %v1473_v52 = vmul.f32 %v2438_v51, %v1274_v50 }
 0x6ab   :  { %v1474_v59 = vmul.f32 %v1473_v52, %v1432_v28  ;;  %v1480_v41 = vrot.slane %v1473_v52, %v2781_v43 }
 0x6ad   :  { %v1475_v60 = vsub.f32 %v1275_v53, %v1474_v59  ;;  %v1482_v58 = vmul.f32 %v1480_v41, %v3093_v4  ;;  %v1483_v19 = vmul.f32 %v1480_v41, %v3091_v3  ;;  %v1484_v7 = vmul.f32 %v1480_v41, %v3101_v16 }
 0x6ae   :  { %v1485_v15 = vmul.f32 %v1480_v41, %v3099_v11  ;;  %v1486_v28 = vmul.f32 %v1480_v41, %v3109_v36  ;;  %v1487_v3 = vmul.f32 %v1480_v41, %v3107_v35  ;;  %v1488_v4 = vmul.f32 %v1480_v41, %v3117_v57 }
 0x6af   :  { %v1494_v13 = vrot.slane %v1475_v60, %v2781_v43  ;;  %v1489_v36 = vmul.f32 %v1480_v41, %v3115_v56  ;;  %v1755_v56 = vld [vmem:[%s3292_s19] sm:$0xff] }
 0x6b0   :  { %2369 = vmatprep.subr.mxu0 %v1755_v56 }
 0x6b1   :  { %v1496_v18 = vadd.f32 %v1494_v13, %v1482_v58  ;;  %v1497_v6 = vadd.f32 %v1494_v13, %v1483_v19  ;;  %v1498_v31 = vadd.f32 %v1494_v13, %v1484_v7  ;;  %v1499_v27 = vadd.f32 %v1494_v13, %v1485_v15  ;;  %2370 = vmatpush3.msra.mxu0 %v1755_v56 }
 0x6b2   :  { %v1500_v61 = vadd.f32 %v1494_v13, %v1486_v28  ;;  %v1501_v11 = vadd.f32 %v1494_v13, %v1487_v3  ;;  %v1502_v26 = vadd.f32 %v1494_v13, %v1488_v4  ;;  %v1503_v63 = vadd.f32 %v1494_v13, %v1489_v36 }
 0x6b3   :  { %v1504_v14 = vmax.f32 %v1496_v18, 0.0  ;;  %v1505_v40 = vmax.f32 %v1497_v6, 0.0  ;;  %v1506_v42 = vmax.f32 %v1498_v31, 0.0  ;;  %v1507_v16 = vmax.f32 %v1499_v27, 0.0 }
 0x6b4   :  { %v1508_v62 = vmax.f32 %v1500_v61, 0.0  ;;  %v1509_v46 = vmax.f32 %v1501_v11, 0.0  ;;  %v1510_v35 = vmax.f32 %v1502_v26, 0.0  ;;  %v1511_v57 = vmax.f32 %v1503_v63, 0.0 }
 0x6b5   :  { %2351 = vmatprep.mubr.msk.f32.mxu1 %vm290_vm1, %v1504_v14 }
 0x6b6   :  { %2352 = vmatmul.mubr.msk.f32.vlgmr.msra.gmra.mxu1 %vm290_vm1, %v1505_v40 }
 0x6b7   :  { %2354 = vmatprep.mubr.msk.f32.mxu1 %vm290_vm1, %v1506_v42  ;;  %2387 = vmatpush3.msra.mxu1 %v1758_v25 }
 0x6b8   :  { %2384 = vmatprep.subr.mxu1 %v1757_v32 }
 0x6b9   :  { %2388 = vmatpush3.msra.mxu1 %v1757_v32 }
 0x6ba   :  { %2355 = vmatmul.mubr.msk.f32.gmra.mxu1 %vm290_vm1, %v1507_v16  ;;  %2385 = vmatprep.subr.mxu1 %v1756_v47 }
 0x6bb   :  { %2357 = vmatprep.mubr.msk.f32.mxu1 %vm290_vm1, %v1508_v62  ;;  %2389 = vmatpush3.msra.mxu1 %v1756_v47 }
 0x6bc   :  { %2386 = vmatprep.subr.mxu1 %v1755_v56 }
 0x6bd   :  { %2390 = vmatpush3.msra.mxu1 %v1755_v56 }
 0x6be   :  { %2358 = vmatmul.mubr.msk.f32.gmra.mxu1 %vm290_vm1, %v1509_v46 }
 0x6bf   :  { %2360 = vmatprep.mubr.msk.f32.mxu1 %vm290_vm1, %v1510_v35 }
 0x6c2   :  { %2361 = vmatmul.mubr.msk.f32.gmra.mxu1 %vm290_vm1, %v1511_v57 }
 0x776   :  { %v2353_v39 = vpop.f32.mrf.mxu1 }
 0x777   :  { %v3164_v23 = vadd.f32 %v2353_v39, %v2079_v24 }
 0x778   :  { %v1615_v55 = vpop.f32.mrf.mxu1 }
 0x779   :  { %v3166_v0 = vadd.f32 %v2079_v24, %v1615_v55  ;;  %v1655_v29 = vsel %vm290_vm1, %v3164_v23, 0.0 }
 0x77a   :  { %v2356_v54 = vpop.f32.mrf.mxu1 }
 0x77b   :  { %v1654_v30 = vsel %vm290_vm1, %v3166_v0, 0.0  ;;  %v3172_v38 = vadd.f32 %v2356_v54, %v2079_v24 }
 0x77c   :  { %v1625_v12 = vpop.f32.mrf.mxu1  ;;  %v1656_v44 = vadd.f32 %v1655_v29, %v1654_v30 }
 0x77d   :  { %v3174_v37 = vadd.f32 %v2079_v24, %v1625_v12  ;;  %v1659_v8 = vsel %vm290_vm1, %v3172_v38, 0.0 }
 0x77e   :  { %v2359_v45 = vpop.f32.mrf.mxu1 }
 0x77f   :  { %v1657_v1 = vsel %vm290_vm1, %v3174_v37, 0.0  ;;  %v3180_v9 = vadd.f32 %v2359_v45, %v2079_v24 }
 0x780   :  { %v1658_v2 = vadd.f32 %v1657_v1, %v1656_v44  ;;  %v1635_v5 = vpop.f32.mrf.mxu1 }
 0x781   :  { %v3182_v10 = vadd.f32 %v2079_v24, %v1635_v5  ;;  %v1663_v34 = vsel %vm290_vm1, %v3180_v9, 0.0 }
 0x782   :  { %v1660_v17 = vadd.f32 %v1659_v8, %v1658_v2  ;;  %v2362_v20 = vpop.f32.mrf.mxu1 }
 0x783   :  { %v1661_v21 = vsel %vm290_vm1, %v3182_v10, 0.0  ;;  %v3188_v48 = vadd.f32 %v2362_v20, %v2079_v24 }
 0x784   :  { %v1662_v22 = vadd.f32 %v1661_v21, %v1660_v17  ;;  %v1645_v33 = vpop.f32.mrf.mxu1  ;;  %v1517_v21 = vld [vmem:[%s3294_s6] sm:$0x1] }
 0x785   :  { %v1646_v49 = vadd.f32 %v2079_v24, %v1645_v33  ;;  %v1667_v53 = vsel %vm290_vm1, %v3188_v48, 0.0 }
 0x786   :  { %v1664_v50 = vadd.f32 %v1663_v34, %v1662_v22  ;;  %v1518_v34 = vld [vmem:[%s3295_s12] sm:$0x1] }
 0x787   :  { %v1665_v51 = vsel %vm290_vm1, %v1646_v49, 0.0 }
 0x788   :  { %v1666_v52 = vadd.f32 %v1665_v51, %v1664_v50 }
 0x78a   :  { %v1668_v59 = vadd.f32 %v1667_v53, %v1666_v52 }
 0x78c   :  { %v1669_v41 = vrot.slane %v1668_v59, 4 }
 0x78e   :  { %v1670_v60 = vadd.f32 %v1669_v41, %v1668_v59 }
 0x790   :  { %v1671_v13 = vrot.slane %v1670_v60, 2 }
 0x792   :  { %v1672_v58 = vadd.f32 %v1671_v13, %v1670_v60 }
 0x794   :  { %v1673_v19 = vrot.slane %v1672_v58, 1 }
 0x796   :  { %v1674_v7 = vadd.f32 %v1673_v19, %v1672_v58 }
 0x798   :  { %v1675_v18 = vmul.f32 0.015625, %v1674_v7 }
 0x79a   :  { %v1676_v6 = vsub.f32 %v3166_v0, %v1675_v18  ;;  %v1677_v31 = vsub.f32 %v3164_v23, %v1675_v18  ;;  %v1678_v15 = vsub.f32 %v3174_v37, %v1675_v18  ;;  %v1679_v14 = vsub.f32 %v3172_v38, %v1675_v18 }
 0x79b   :  { %v1680_v40 = vsub.f32 %v3182_v10, %v1675_v18  ;;  %v1681_v61 = vsub.f32 %v3180_v9, %v1675_v18  ;;  %v1682_v26 = vsub.f32 %v1646_v49, %v1675_v18  ;;  %v1683_v63 = vsub.f32 %v3188_v48, %v1675_v18 }
 0x79c   :  { %v1684_v28 = vmul.f32 %v1676_v6, %v1676_v6  ;;  %v1685_v27 = vmul.f32 %v1677_v31, %v1677_v31  ;;  %v1686_v42 = vmul.f32 %v1678_v15, %v1678_v15  ;;  %v1687_v3 = vmul.f32 %v1679_v14, %v1679_v14 }
 0x79d   :  { %v1688_v62 = vmul.f32 %v1680_v40, %v1680_v40  ;;  %v1689_v35 = vmul.f32 %v1681_v61, %v1681_v61  ;;  %v1690_v32 = vmul.f32 %v1682_v26, %v1682_v26  ;;  %v1691_v39 = vmul.f32 %v1683_v63, %v1683_v63 }
 0x79e   :  { %v1692_v4 = vsel %vm290_vm1, %v1684_v28, 0.0  ;;  %v1693_v16 = vsel %vm290_vm1, %v1685_v27, 0.0  ;;  %v1695_v36 = vsel %vm290_vm1, %v1686_v42, 0.0  ;;  %v1697_v57 = vsel %vm290_vm1, %v1687_v3, 0.0 }
 0x79f   :  { %v1694_v11 = vadd.f32 %v1693_v16, %v1692_v4  ;;  %v1699_v47 = vsel %vm290_vm1, %v1688_v62, 0.0  ;;  %v1701_v24 = vsel %vm290_vm1, %v1689_v35, 0.0  ;;  %v1703_v54 = vsel %vm290_vm1, %v1690_v32, 0.0 }
 0x7a0   :  { %v1705_v12 = vsel %vm290_vm1, %v1691_v39, 0.0 }
 0x7a1   :  { %v1696_v46 = vadd.f32 %v1695_v36, %v1694_v11 }
 0x7a3   :  { %v1698_v25 = vadd.f32 %v1697_v57, %v1696_v46 }
 0x7a5   :  { %v1700_v56 = vadd.f32 %v1699_v47, %v1698_v25 }
 0x7a7   :  { %v1702_v55 = vadd.f32 %v1701_v24, %v1700_v56 }
 0x7a9   :  { %v1704_v30 = vadd.f32 %v1703_v54, %v1702_v55 }
 0x7ab   :  { %v1706_v29 = vadd.f32 %v1705_v12, %v1704_v30 }
 0x7ad   :  { %v1707_v44 = vrot.slane %v1706_v29, 4 }
 0x7af   :  { %v1708_v45 = vadd.f32 %v1707_v44, %v1706_v29 }
 0x7b1   :  { %v1709_v1 = vrot.slane %v1708_v45, 2 }
 0x7b3   :  { %v1710_v2 = vadd.f32 %v1709_v1, %v1708_v45 }
 0x7b5   :  { %v1711_v5 = vrot.slane %v1710_v2, 1 }
 0x7b7   :  { %v1712_v8 = vadd.f32 %v1711_v5, %v1710_v2 }
 0x7b9   :  { %v1713_v17 = vmul.f32 0.015625, %v1712_v8 }
 0x7bb   :  { %v1714_v20 = vadd.f32 1e-05, %v1713_v17 }
 0x7bd   :  { %2439 = vrsqrt.f32 %v1714_v20 }
 0x7ca   :  { %v2440_v22 = vpop.eup %2439 }
 0x7cb   :  { %v1716_v33 = vmul.f32 %v2440_v22, %v1517_v21 }
 0x7cd   :  { %v1717_v50 = vmul.f32 %v1716_v33, %v1675_v18  ;;  %v1723_v51 = vrot.slane %v1716_v33, %v2781_v43 }
 0x7cf   :  { %v1718_v52 = vsub.f32 %v1518_v34, %v1717_v50  ;;  %v1731_v53 = vmul.f32 %v1723_v51, %v1646_v49  ;;  %v1725_v41 = vmul.f32 %v1723_v51, %v3166_v0  ;;  %v1726_v60 = vmul.f32 %v1723_v51, %v3164_v23 }
 0x7d0   :  { %v1732_v13 = vmul.f32 %v1723_v51, %v3188_v48  ;;  %v1727_v58 = vmul.f32 %v1723_v51, %v3174_v37  ;;  %v1728_v19 = vmul.f32 %v1723_v51, %v3172_v38  ;;  %v1729_v7 = vmul.f32 %v1723_v51, %v3182_v10 }
 0x7d1   :  { %v1737_v59 = vrot.slane %v1718_v52, %v2781_v43  ;;  %v1730_v18 = vmul.f32 %v1723_v51, %v3180_v9 }
 0x7d3   :  { %v1745_v6 = vadd.f32 %v1737_v59, %v1731_v53  ;;  %v1739_v31 = vadd.f32 %v1737_v59, %v1725_v41  ;;  %v1740_v49 = vadd.f32 %v1737_v59, %v1726_v60  ;;  %v1746_v15 = vadd.f32 %v1737_v59, %v1732_v13 }
 0x7d4   :  { %v1741_v43 = vadd.f32 %v1737_v59, %v1727_v58  ;;  %v1742_v0 = vadd.f32 %v1737_v59, %v1728_v19  ;;  %v1743_v23 = vadd.f32 %v1737_v59, %v1729_v7  ;;  %v1744_v48 = vadd.f32 %v1737_v59, %v1730_v18 }
 0x7d5   :  { %v1747_v14 = vmax.f32 %v1739_v31, 0.0  ;;  %v1753_v37 = vmax.f32 %v1745_v6, 0.0  ;;  %v1748_v38 = vmax.f32 %v1740_v49, 0.0  ;;  %v1754_v10 = vmax.f32 %v1746_v15, 0.0 }
 0x7d6   :  { %v1749_v9 = vmax.f32 %v1741_v43, 0.0  ;;  %v1750_v40 = vmax.f32 %v1742_v0, 0.0  ;;  %v1751_v28 = vmax.f32 %v1743_v23, 0.0  ;;  %v1752_v27 = vmax.f32 %v1744_v48, 0.0 }
 0x7d7   :  { %2371 = vmatprep.mubr.msk.f32.mxu0 %vm290_vm1, %v1747_v14  ;;  %1935 = vst.msk [vmem:[%s2701_s24] sm:$0xff] %vm290_vm1, %v1747_v14  ;;  %2380 = vmatprep.mubr.msk.f32.mxu1 %vm290_vm1, %v1753_v37  ;;  %1941 = vst.msk [vmem:[%s2701_s24 + $0x30] sm:$0xff] %vm290_vm1, %v1753_v37 }
 0x7d8   :  { %1936 = vst.msk [vmem:[%s2701_s24 + $0x8] sm:$0xff] %vm290_vm1, %v1748_v38  ;;  %1942 = vst.msk [vmem:[%s2701_s24 + $0x38] sm:$0xff] %vm290_vm1, %v1754_v10  ;;  %2372 = vmatmul.mubr.msk.f32.vlgmr.msra.gmra.mxu0 %vm290_vm1, %v1748_v38  ;;  %2381 = vmatmul.mubr.msk.f32.vlgmr.msra.gmra.mxu1 %vm290_vm1, %v1754_v10 }
 0x7d9   :  { %1937 = vst.msk [vmem:[%s2701_s24 + $0x10] sm:$0xff] %vm290_vm1, %v1749_v9  ;;  %1938 = vst.msk [vmem:[%s2701_s24 + $0x18] sm:$0xff] %vm290_vm1, %v1750_v40  ;;  %2374 = vmatprep.mubr.msk.f32.mxu0 %vm290_vm1, %v1749_v9 }
 0x7da   :  { %1939 = vst.msk [vmem:[%s2701_s24 + $0x20] sm:$0xff] %vm290_vm1, %v1751_v28  ;;  %1940 = vst.msk [vmem:[%s2701_s24 + $0x28] sm:$0xff] %vm290_vm1, %v1752_v27 }
 0x7dc   :  { %2375 = vmatmul.mubr.msk.f32.gmra.mxu0 %vm290_vm1, %v1750_v40 }
 0x7dd   :  { %2377 = vmatprep.mubr.msk.f32.mxu0 %vm290_vm1, %v1751_v28 }
 0x7e0   :  { %2378 = vmatmul.mubr.msk.f32.gmra.mxu0 %vm290_vm1, %v1752_v27 }
 0x7e1   :  { %2452 = shalt.err (!%p2449_p4)
}
 0x7e2   :  { %s2520_s16 = smov 128   ;;  %s3296_s24 = sld [smem:[#allocation23_spill]] }
 0x7e3   :  { %s2521_s18 = smov 8  }
 0x7e4   :  { %1970 = dma.vmem_to_hbm [thread:$0]  %s1965_s4, 1024, %s2691_s27, [#allocation5], %s2520_s16, %s2520_s16, %s2521_s18  }
 0x7e5   :  { %s2522_s27 = smov [#allocation2]  }
 0x7e6   :  { %s1948_s22 = sshll.u32 %s2522_s27, 4  ;;  %s1949_s22 = int_to_ptr.vmem [resolvable:$true] %s1948_s22 }
 0x7e7   :  { %s2461_s23 = scalar_lea.vmem %s1949_s22, 1024  ;;  %p2466_p6 = scmp.lt.s32.totalorder %s1949_s22, %s1949_s22 }
 0x7e8   :  { %v2088_v42 = vld [vmem:[%s3296_s24] ss:$0 sm:$0xff]  ;;  %p2462_p5 = scmp.ne.s32.totalorder %s1949_s22, %s2461_s23  ;;  %p2467_p7 = scmp.lt.s32.totalorder %s2461_s23, %s2461_s23 }
 0x7ea   :  { %p2468_p8 = por %p2467_p7, %p2466_p6 }
 0x7ec   :  { %p2469_p9 = pnand %p2468_p8, %p2462_p5 }
 0x898   :  { %v2373_v61 = vpop.f32.mrf.mxu0  ;;  %v2382_v3 = vpop.f32.mrf.mxu1 }
 0x899   :  { %v1862_v4 = vadd.f32 %v2373_v61, %v2088_v42  ;;  %v1892_v16 = vadd.f32 %v2382_v3, %v2088_v42 }
 0x89a   :  { %v1856_v11 = vpop.f32.mrf.mxu0  ;;  %v1886_v26 = vpop.f32.mrf.mxu1 }
 0x89b   :  { %1896 = vst.msk [vmem:[#allocation2 + $0x8] sm:$0xff] %vm160_vm0, %v1862_v4  ;;  %1902 = vst.msk [vmem:[#allocation2 + $0x38] sm:$0xff] %vm160_vm0, %v1892_v16  ;;  %v1857_v62 = vadd.f32 %v2088_v42, %v1856_v11  ;;  %v1887_v36 = vadd.f32 %v2088_v42, %v1886_v26 }
 0x89c   :  { %v2376_v46 = vpop.f32.mrf.mxu0 }
 0x89d   :  { %1895 = vst.msk [vmem:[#allocation2] sm:$0xff] %vm160_vm0, %v1857_v62  ;;  %1901 = vst.msk [vmem:[#allocation2 + $0x30] sm:$0xff] %vm160_vm0, %v1887_v36  ;;  %v1872_v63 = vadd.f32 %v2376_v46, %v2088_v42 }
 0x89e   :  { %v1866_v35 = vpop.f32.mrf.mxu0 }
 0x89f   :  { %1898 = vst.msk [vmem:[#allocation2 + $0x18] sm:$0xff] %vm160_vm0, %v1872_v63  ;;  %v1867_v57 = vadd.f32 %v2088_v42, %v1866_v35 }
 0x8a0   :  { %v2379_v25 = vpop.f32.mrf.mxu0 }
 0x8a1   :  { %1897 = vst.msk [vmem:[#allocation2 + $0x10] sm:$0xff] %vm160_vm0, %v1867_v57  ;;  %v1882_v32 = vadd.f32 %v2379_v25, %v2088_v42 }
 0x8a2   :  { %v1876_v47 = vpop.f32.mrf.mxu0 }
 0x8a3   :  { %1900 = vst.msk [vmem:[#allocation2 + $0x28] sm:$0xff] %vm160_vm0, %v1882_v32  ;;  %v1877_v56 = vadd.f32 %v2088_v42, %v1876_v47 }
 0x8a5   :  { %1899 = vst.msk [vmem:[#allocation2 + $0x20] sm:$0xff] %vm160_vm0, %v1877_v56 }
 0x8a6   :  { %2472 = shalt.err (!%p2469_p9)
}
 0x8a7   :  { %s3297_s26 = sld [smem:[#allocation24_spill]] }
 0x8ad   :  { %1954 = dma.vmem_to_hbm [thread:$0]  %s1949_s22, 1024, %s3297_s26, [#allocation3], %s2520_s16, %s2520_s16, %s2521_s18  }
 0x8ae   :  { %2481 = dma.done.wait [#allocation3], 1024  }
 0x8af   :  { %2482 = vsyncadd [#allocation3], 4294966272 }
 0x8b0   :  { %2483 = dma.done.wait [#allocation5], 1024  }
 0x8b1   :  { %2484 = vsyncadd [#allocation5], 4294966272 }
 0x8b2   :  { %1989 = vsyncpa [#allocation3], 1 }
 0x8b3   :  { %1990 = vsyncpa [#allocation5], 1 }

</bundles_post_ra>
